<compile_context>
chip_gen: v6e
topology: v6e:2x2x1
jax: 0.10.0
libtpu: 0.0.40
codegen_flags: <defaults>
</compile_context>

<pallas_src>
import functools

import numpy as np
import jax
import jax.numpy as jnp
from jax.experimental import pallas as pl
from jax.experimental.pallas import tpu as pltpu


# ----------------------------------------------------------------------------
# Fused Pallas kernel: whole CNNBlock_branch2 for one sample per grid step
# ----------------------------------------------------------------------------

def _fused_block_kernel(*refs, dilations, T, V, d_max, cb, res_mode,
                        fuse_res, tap_mode, row_chunk):
    if res_mode == "conv" and not fuse_res:
        (x_ref, w1_ref, b1_ref, w2_ref, b2_ref, wr_ref, br_ref,
         o_ref, h_ref) = refs
    else:
        (x_ref, w1_ref, b1_ref, w2_ref, b2_ref, o_ref, h_ref) = refs
        wr_ref = br_ref = None

    tv = T * V
    pad_rows = d_max * V
    cout = b2_ref.shape[1]
    nb = len(dilations)

    # Zero the temporal pad strips every step (see header comment re: megacore
    # scratch ownership -- a program_id==0 guard would be wrong on 2-TC chips).
    zpad = jnp.zeros((pad_rows, cout), h_ref.dtype)
    h_ref[pl.ds(0, pad_rows), :] = zpad
    h_ref[pl.ds(pad_rows + tv, pad_rows), :] = zpad

    # ---- Phase 1: 1x1 CBR (all branches in one matmul; BN folded into the
    #      weights) + optional fused residual projection.  Row-chunked. ------
    for r0 in range(0, tv, row_chunk):
        rs = min(row_chunk, tv - r0)
        xc = x_ref[0, pl.ds(r0, rs), :]
        y = jnp.dot(xc, w1_ref[...], preferred_element_type=jnp.float32)
        y = y + b1_ref[...]
        if fuse_res:
            h = jnp.maximum(y[:, :cout], 0.0)
            # Park the residual projection in the output VMEM block; it is
            # read back and overwritten in phase 2 (no extra scratch).
            o_ref[0, pl.ds(r0, rs), :] = y[:, cout:].astype(o_ref.dtype)
        else:
            h = jnp.maximum(y, 0.0)
        h_ref[pl.ds(pad_rows + r0, rs), :] = h.astype(h_ref.dtype)

    # ---- Phase 2: (3,1) dilated temporal conv (BN folded into taps) +
    #      branch concat + residual + one lane-dense store per chunk. --------
    for r0 in range(0, tv, row_chunk):
        rs = min(row_chunk, tv - r0)

        if tap_mode == "fused":
            # Cout <= 128: block-diagonal taps; all nb center taps share the
            # same row offset and are pre-merged into w2[0].
            acc = jnp.dot(h_ref[pl.ds(pad_rows + r0, rs), :], w2_ref[0],
                          preferred_element_type=jnp.float32)
            ti = 1
            for d in dilations:
                for k in (0, 2):
                    off = pad_rows + r0 + (k - 1) * d * V
                    acc = acc + jnp.dot(h_ref[pl.ds(off, rs), :], w2_ref[ti],
                                        preferred_element_type=jnp.float32)
                    ti += 1
        else:
            # Cout > 128: per-branch (rows,Cb)x(Cb,Cb) dots, one lane concat.
            parts = []
            for j, d in enumerate(dilations):
                c0 = j * cb
                a = None
                for k in range(3):
                    off = pad_rows + r0 + (k - 1) * d * V
                    hc = h_ref[pl.ds(off, rs), pl.ds(c0, cb)]
                    p = jnp.dot(hc, w2_ref[3 * j + k],
                                preferred_element_type=jnp.float32)
                    a = p if a is None else a + p
                parts.append(a)
            acc = parts[0] if nb == 1 else jnp.concatenate(parts, axis=-1)

        out = acc + b2_ref[...]

        if fuse_res:
            out = out + o_ref[0, pl.ds(r0, rs), :].astype(jnp.float32)
        elif res_mode == "conv":
            r = jnp.dot(x_ref[0, pl.ds(r0, rs), :], wr_ref[...],
                        preferred_element_type=jnp.float32)
            out = out + (r + br_ref[...])
        else:  # identity residual
            out = out + x_ref[0, pl.ds(r0, rs), :].astype(jnp.float32)

        o_ref[0, pl.ds(r0, rs), :] = out.astype(o_ref.dtype)


# ----------------------------------------------------------------------------
# BN folding helper: y = conv(x)*scale + bias  (scale is folded into weights)
# ----------------------------------------------------------------------------

def fold_bn(p):
    scale = p["gamma"] / jnp.sqrt(p["var"] + p["eps"])
    bias = (p["b"] - p["mean"]) * scale + p["beta"]
    return scale, bias


# ----------------------------------------------------------------------------
# Forward wrapper (layout change happens exactly once at the block boundary)
# ----------------------------------------------------------------------------

def cnn_block_branch2_forward(x, params, *, compute_dtype=jnp.bfloat16,
                              row_chunk=None):
    n, cin, t, v = x.shape
    branches = params["branches"]
    nb = len(branches)
    cb = branches[0]["cbr1"]["w"].shape[0]
    cout = nb * cb
    dilations = tuple(int(b["dilation"]) for b in branches)
    d_max = max(dilations)

    # --- internal V padding to a sublane multiple (exact: padded joints only
    #     feed padded output rows, which are sliced off below) ---------------
    v_pad = ((v + 7) // 8) * 8
    tvp = t * v_pad

    x_nlc = jnp.transpose(x, (0, 2, 3, 1))                     # (N, T, V, Cin)
    if v_pad != v:
        x_nlc = jnp.pad(x_nlc, ((0, 0), (0, 0), (0, v_pad - v), (0, 0)))
    x2 = x_nlc.reshape(n, tvp, cin).astype(compute_dtype)

    # --- fold BN scales into the conv weights (keep only additive biases) ---
    w1_cols, b1_list, b2_list, taps = [], [], [], []
    for bp in branches:
        c1p, c2p = bp["cbr1"], bp["cbr2"]
        s1, b1b = fold_bn(c1p)
        s2, b2b = fold_bn(c2p)
        w1_cols.append(c1p["w"][:, :, 0, 0].T * s1[None, :])   # (Cin, Cb)
        b1_list.append(b1b)
        b2_list.append(b2b)
        taps.append([c2p["w"][:, :, k, 0].T * s2[None, :] for k in range(3)])

    if params["residual"] is None:
        assert cin == cout, "identity residual requires Cin == Cout"
        res_mode, wr, br = "identity", None, None
    else:
        res_mode = "conv"
        rp = params["residual"]
        sr, brb = fold_bn(rp)
        wr = rp["w"][:, :, 0, 0].T * sr[None, :]                # (Cin, Cout)
        br = brb
    # fuse residual projection into the CBR1 matmul only when it saves an MXU
    # pass (Cout not already a multiple of 128)
    fuse_res = (res_mode == "conv") and (cout % 128 != 0)

    w1 = jnp.concatenate(w1_cols, axis=1)                       # (Cin, Cout)
    b1 = jnp.concatenate(b1_list)
    if fuse_res:
        w1 = jnp.concatenate([w1, wr], axis=1)                  # (Cin, 2*Cout)
        b1 = jnp.concatenate([b1, br])

    # --- temporal tap weights -----------------------------------------------
    tap_mode = "fused" if cout <= 128 else "branch"
    if tap_mode == "fused":
        def blockdiag(blocks):
            m = jnp.zeros((cout, cout), jnp.float32)
            for j, blk in enumerate(blocks):
                if blk is not None:
                    m = m.at[j * cb:(j + 1) * cb, j * cb:(j + 1) * cb].set(blk)
            return m
        w2_list = [blockdiag([taps[j][1] for j in range(nb)])]   # merged centers
        for j in range(nb):
            for k in (0, 2):
                w2_list.append(blockdiag([taps[jj][k] if jj == j else None
                                          for jj in range(nb)]))
        w2 = jnp.stack(w2_list)                                  # (2nb+1,Cout,Cout)
    else:
        w2 = jnp.stack([taps[j][k] for j in range(nb) for k in range(3)])
        # (3nb, Cb, Cb)

    w1 = w1.astype(compute_dtype)
    w2 = w2.astype(compute_dtype)
    b1 = b1.reshape(1, -1).astype(jnp.float32)
    b2 = jnp.concatenate(b2_list).reshape(1, cout).astype(jnp.float32)

    inputs = [x2, w1, b1, w2, b2]
    in_specs = [
        pl.BlockSpec((1, tvp, cin), lambda i: (i, 0, 0)),        # x (per sample)
        pl.BlockSpec(w1.shape, lambda i: (0, 0)),                # fused w1 [| wr]
        pl.BlockSpec(b1.shape, lambda i: (0, 0)),                # bias1 [| br]
        pl.BlockSpec(w2.shape, lambda i: (0, 0, 0)),             # temporal taps
        pl.BlockSpec(b2.shape, lambda i: (0, 0)),                # bias2
    ]
    if res_mode == "conv" and not fuse_res:
        wr_c = wr.astype(compute_dtype)
        br_c = br.reshape(1, cout).astype(jnp.float32)
        inputs += [wr_c, br_c]
        in_specs += [pl.BlockSpec(wr_c.shape, lambda i: (0, 0)),
                     pl.BlockSpec(br_c.shape, lambda i: (0, 0))]

    # row chunking keeps live values under the vreg file at real T*V
    if row_chunk is None:
        row_chunk = tvp if tvp <= 512 else 512
    row_chunk = int(min(max(8, (row_chunk // 8) * 8), tvp))

    # --- advisory cost estimate (real FLOPs only, no zero blocks) -----------
    bpe = jnp.dtype(compute_dtype).itemsize
    c1w = int(w1.shape[1])
    flops = 2 * n * tvp * cin * c1w
    if tap_mode == "fused":
        flops += (2 * nb + 1) * 2 * n * tvp * cout * cout
    else:
        flops += 3 * nb * 2 * n * tvp * cb * cb
    if res_mode == "conv" and not fuse_res:
        flops += 2 * n * tvp * cin * cout
    bytes_accessed = int(x2.size * bpe + n * tvp * cout * 4
                         + w1.size * bpe + w2.size * bpe
                         + (b1.size + b2.size) * 4)
    if res_mode == "conv" and not fuse_res:
        bytes_accessed += int(wr.size * bpe + cout * 4)

    # --- VMEM budget (only raise the scoped limit when actually needed) -----
    h_rows = (t + 2 * d_max) * v_pad
    vmem_est = (2 * tvp * cin * bpe + 2 * tvp * cout * 4            # dbl-buf I/O
                + 2 * (int(w1.size) + int(w2.size)) * bpe           # weights
                + h_rows * cout * bpe + (1 << 20))                  # h scratch
    vmem_limit = (int(min(110 * 2**20, int(1.25 * vmem_est)))
                  if vmem_est > 24 * 2**20 else None)

    kernel = functools.partial(
        _fused_block_kernel, dilations=dilations, T=t, V=v_pad, d_max=d_max,
        cb=cb, res_mode=res_mode, fuse_res=fuse_res, tap_mode=tap_mode,
        row_chunk=row_chunk)

    out2 = pl.pallas_call(
        kernel,
        out_shape=jax.ShapeDtypeStruct((n, tvp, cout), x.dtype),
        grid=(n,),
        in_specs=in_specs,
        out_specs=pl.BlockSpec((1, tvp, cout), lambda i: (i, 0, 0)),
        scratch_shapes=[pltpu.VMEM((h_rows, cout), compute_dtype)],
        compiler_params=pltpu.CompilerParams(
            dimension_semantics=("parallel",),
            vmem_limit_bytes=vmem_limit),
        cost_estimate=pl.CostEstimate(flops=int(flops), transcendentals=0,
                                      bytes_accessed=int(bytes_accessed)),
    )(*inputs)

    # --- one-time layout change back to NCHW (drop internal V padding) ------
    out_ntvc = out2.reshape(n, t, v_pad, cout)[:, :, :v, :]
    return jnp.transpose(out_ntvc, (0, 3, 1, 2))


# ----------------------------------------------------------------------------
# Deterministic parameter init (shapes from the module's __init__)
# ----------------------------------------------------------------------------

def init_cbr(key, cin, cout, ks):
    k1, k2, k3, k4, k5, k6 = jax.random.split(key, 6)
    return {
        "w": 0.2 * jax.random.normal(k1, (cout, cin, ks, 1), jnp.float32),
        "b": 0.1 * jax.random.normal(k2, (cout,), jnp.float32),
        "gamma": 1.0 + 0.1 * jax.random.normal(k3, (cout,), jnp.float32),
        "beta": 0.1 * jax.random.normal(k4, (cout,), jnp.float32),
        "mean": 0.1 * jax.random.normal(k5, (cout,), jnp.float32),
        "var": jax.random.uniform(k6, (cout,), jnp.float32, 0.5, 1.5),
        "eps": 1e-5,
    }


def init_params(key, cin, cout, kernel_size=3, dilations=(1, 2)):
    nb = len(dilations)
    assert cout % nb == 0
    cb = cout // nb
    keys = jax.random.split(key, 2 * nb + 1)
    branches = []
    for i, d in enumerate(dilations):
        branches.append({
            "cbr1": init_cbr(keys[2 * i], cin, cb, 1),
            "cbr2": init_cbr(keys[2 * i + 1], cb, cb, kernel_size),
            "dilation": d,
        })
    residual = None if cin == cout else init_cbr(keys[-1], cin, cout, 1)
    return {"branches": branches, "residual": residual}


# ----------------------------------------------------------------------------
# Pure-JAX reference (for correctness check)
# ----------------------------------------------------------------------------

def _ref_bn(y, p):
    r = lambda a: a.reshape(1, -1, 1, 1)
    return ((y - r(p["mean"])) / jnp.sqrt(r(p["var"]) + p["eps"])
            * r(p["gamma"]) + r(p["beta"]))


def _ref_conv(x, p, padding, dilation):
    y = jax.lax.conv_general_dilated(
        x, p["w"], window_strides=(1, 1), padding=padding,
        rhs_dilation=dilation, dimension_numbers=("NCHW", "OIHW", "NCHW"),
        precision=jax.lax.Precision.HIGHEST)
    return y + p["b"].reshape(1, -1, 1, 1)


def reference_forward(x, params):
    if params["residual"] is None:
        res = x
    else:
        res = _ref_bn(_ref_conv(x, params["residual"], ((0, 0), (0, 0)), (1, 1)),
                      params["residual"])
    outs = []
    for bp in params["branches"]:
        d = bp["dilation"]
        h = _ref_bn(_ref_conv(x, bp["cbr1"], ((0, 0), (0, 0)), (1, 1)), bp["cbr1"])
        h = jnp.maximum(h, 0.0)
        h = _ref_bn(_ref_conv(h, bp["cbr2"], ((d, d), (0, 0)), (d, 1)), bp["cbr2"])
        outs.append(h)
    return jnp.concatenate(outs, axis=1) + res


# ----------------------------------------------------------------------------

if __name__ == "__main__":
    key = jax.random.PRNGKey(0)

    #  name            N  Cin Cout  T   V  dil     dtype        row_chunk rtol  atol
    cases = [
        ("blockdiag_f32", 2,   4,   8, 16, 16, (1, 2), jnp.float32,  None, 1e-2, 1e-2),
        ("perbranch_f32", 1, 256, 256,  8, 16, (1, 2), jnp.float32,    64, 2e-2, 2e-2),
        ("vpad17_bf16",   2,   8,  16, 12, 17, (1, 2), jnp.bfloat16, None, 5e-2, 5e-2),
    ]

    for idx, (name, N, C_IN, C_OUT, T, V, dil, cdt, rc, rtol, atol) in enumerate(cases):
        k_x, k_p = jax.random.split(jax.random.fold_in(key, idx))
        x = jax.random.normal(k_x, (N, C_IN, T, V), jnp.float32)
        params = init_params(k_p, C_IN, C_OUT, kernel_size=3, dilations=list(dil))

        out = cnn_block_branch2_forward(x, params, compute_dtype=cdt, row_chunk=rc)
        out = jax.block_until_ready(out)
        assert out.shape == (N, C_OUT, T, V), (name, out.shape)

        ref = reference_forward(x, params)
        np.testing.assert_allclose(np.asarray(out), np.asarray(ref),
                                   rtol=rtol, atol=atol,
                                   err_msg=f"case {name} mismatch")

    print("KERNEL_OK")
</pallas_src>

<mosaic_0001>
module attributes {stable_mosaic.version = 11 : i64} {
  func.func @_fused_block_kernel(%arg0: i32, %arg1: memref<1x256x4xf32, #tpu.memory_space<vmem>>, %arg2: memref<4x16xf32, #tpu.memory_space<vmem>>, %arg3: memref<1x16xf32, #tpu.memory_space<vmem>>, %arg4: memref<5x8x8xf32, #tpu.memory_space<vmem>>, %arg5: memref<1x8xf32, #tpu.memory_space<vmem>>, %arg6: memref<1x256x8xf32, #tpu.memory_space<vmem>>, %arg7: memref<320x8xf32, #tpu.memory_space<vmem>>) attributes {dimension_semantics = [#tpu.dimension_semantics<parallel>], iteration_bounds = array<i64: 2>, scalar_prefetch = 0 : i64, scratch_operands = 1 : i64, tpu.core_type = #tpu.core_type<tc>, window_params = [{transform_indices = @transform_0, window_bounds = array<i64: 1, 256, 4>}, {pipeline_mode = #tpu.pipeline_mode<synchronous>, transform_indices = @transform_1, window_bounds = array<i64: 4, 16>}, {pipeline_mode = #tpu.pipeline_mode<synchronous>, transform_indices = @transform_2, window_bounds = array<i64: 1, 16>}, {pipeline_mode = #tpu.pipeline_mode<synchronous>, transform_indices = @transform_3, window_bounds = array<i64: 5, 8, 8>}, {pipeline_mode = #tpu.pipeline_mode<synchronous>, transform_indices = @transform_4, window_bounds = array<i64: 1, 8>}, {transform_indices = @transform_5, window_bounds = array<i64: 1, 256, 8>}]} {
    %cst = arith.constant 0.000000e+00 : f32
    %0 = vector.broadcast %cst : f32 to vector<32x8xf32>
    %c0 = arith.constant 0 : index
    %c0_0 = arith.constant 0 : index
    %1 = vector.load %arg7[%c0, %c0_0] : memref<320x8xf32, #tpu.memory_space<vmem>>, vector<32x8xf32>
    tpu.vector_store %arg7[%c0, %c0_0], %0 {strides = array<i32>} : memref<320x8xf32, #tpu.memory_space<vmem>>, vector<32x8xf32>,
    %c288 = arith.constant 288 : index
    %c0_1 = arith.constant 0 : index
    %2 = vector.load %arg7[%c288, %c0_1] : memref<320x8xf32, #tpu.memory_space<vmem>>, vector<32x8xf32>
    tpu.vector_store %arg7[%c288, %c0_1], %0 {strides = array<i32>} : memref<320x8xf32, #tpu.memory_space<vmem>>, vector<32x8xf32>,
    %c0_2 = arith.constant 0 : index
    %c0_3 = arith.constant 0 : index
    %c0_4 = arith.constant 0 : index
    %3 = vector.load %arg1[%c0_2, %c0_3, %c0_4] : memref<1x256x4xf32, #tpu.memory_space<vmem>>, vector<1x256x4xf32>
    %4 = vector.shape_cast %3 : vector<1x256x4xf32> to vector<256x4xf32>
    %c0_5 = arith.constant 0 : index
    %c0_6 = arith.constant 0 : index
    %5 = vector.load %arg2[%c0_5, %c0_6] : memref<4x16xf32, #tpu.memory_space<vmem>>, vector<4x16xf32>
    %cst_7 = arith.constant dense<0.000000e+00> : vector<256x16xf32>
    %6 = tpu.matmul %4, %5, %cst_7 {dimension_numbers = #tpu.dot_dimension_numbers<[1], [0], [0], [1], [0, 0, 1, 1], [], []>} : vector<256x4xf32>, vector<4x16xf32>, vector<256x16xf32> -> vector<256x16xf32>
    %c0_8 = arith.constant 0 : index
    %c0_9 = arith.constant 0 : index
    %7 = vector.load %arg3[%c0_8, %c0_9] : memref<1x16xf32, #tpu.memory_space<vmem>>, vector<1x16xf32>
    %8 = vector.broadcast %7 : vector<1x16xf32> to vector<256x16xf32>
    %9 = arith.addf %6, %8 : vector<256x16xf32>
    %10 = vector.extract_strided_slice %9 {offsets = [0, 0], sizes = [256, 8], strides = [1, 1]} : vector<256x16xf32> to vector<256x8xf32>
    %cst_10 = arith.constant 0.000000e+00 : f32
    %11 = vector.broadcast %cst_10 : f32 to vector<256x8xf32>
    %12 = arith.maximumf %10, %11 : vector<256x8xf32>
    %13 = vector.extract_strided_slice %9 {offsets = [0, 8], sizes = [256, 8], strides = [1, 1]} : vector<256x16xf32> to vector<256x8xf32>
    %c0_11 = arith.constant 0 : index
    %c0_12 = arith.constant 0 : index
    %c0_13 = arith.constant 0 : index
    %14 = vector.load %arg6[%c0_11, %c0_12, %c0_13] : memref<1x256x8xf32, #tpu.memory_space<vmem>>, vector<1x256x8xf32>
    %15 = vector.shape_cast %14 : vector<1x256x8xf32> to vector<256x8xf32>
    %16 = vector.shape_cast %13 : vector<256x8xf32> to vector<1x256x8xf32>
    tpu.vector_store %arg6[%c0_11, %c0_12, %c0_13], %16 {strides = array<i32>} : memref<1x256x8xf32, #tpu.memory_space<vmem>>, vector<1x256x8xf32>,
    %c32 = arith.constant 32 : index
    %c0_14 = arith.constant 0 : index
    %17 = vector.load %arg7[%c32, %c0_14] : memref<320x8xf32, #tpu.memory_space<vmem>>, vector<256x8xf32>
    tpu.vector_store %arg7[%c32, %c0_14], %12 {strides = array<i32>} : memref<320x8xf32, #tpu.memory_space<vmem>>, vector<256x8xf32>,
    %c32_15 = arith.constant 32 : index
    %c0_16 = arith.constant 0 : index
    %18 = vector.load %arg7[%c32_15, %c0_16] : memref<320x8xf32, #tpu.memory_space<vmem>>, vector<256x8xf32>
    %c0_17 = arith.constant 0 : index
    %c0_18 = arith.constant 0 : index
    %c0_19 = arith.constant 0 : index
    %19 = vector.load %arg4[%c0_17, %c0_18, %c0_19] : memref<5x8x8xf32, #tpu.memory_space<vmem>>, vector<1x8x8xf32>
    %20 = vector.shape_cast %19 : vector<1x8x8xf32> to vector<8x8xf32>
    %cst_20 = arith.constant dense<0.000000e+00> : vector<256x8xf32>
    %21 = tpu.matmul %18, %20, %cst_20 {dimension_numbers = #tpu.dot_dimension_numbers<[1], [0], [0], [1], [0, 0, 1, 1], [], []>} : vector<256x8xf32>, vector<8x8xf32>, vector<256x8xf32> -> vector<256x8xf32>
    %c16 = arith.constant 16 : index
    %c0_21 = arith.constant 0 : index
    %22 = vector.load %arg7[%c16, %c0_21] : memref<320x8xf32, #tpu.memory_space<vmem>>, vector<256x8xf32>
    %c1 = arith.constant 1 : index
    %c0_22 = arith.constant 0 : index
    %c0_23 = arith.constant 0 : index
    %23 = vector.load %arg4[%c1, %c0_22, %c0_23] : memref<5x8x8xf32, #tpu.memory_space<vmem>>, vector<1x8x8xf32>
    %24 = vector.shape_cast %23 : vector<1x8x8xf32> to vector<8x8xf32>
    %cst_24 = arith.constant dense<0.000000e+00> : vector<256x8xf32>
    %25 = tpu.matmul %22, %24, %cst_24 {dimension_numbers = #tpu.dot_dimension_numbers<[1], [0], [0], [1], [0, 0, 1, 1], [], []>} : vector<256x8xf32>, vector<8x8xf32>, vector<256x8xf32> -> vector<256x8xf32>
    %26 = arith.addf %21, %25 : vector<256x8xf32>
    %c48 = arith.constant 48 : index
    %c0_25 = arith.constant 0 : index
    %27 = vector.load %arg7[%c48, %c0_25] : memref<320x8xf32, #tpu.memory_space<vmem>>, vector<256x8xf32>
    %c2 = arith.constant 2 : index
    %c0_26 = arith.constant 0 : index
    %c0_27 = arith.constant 0 : index
    %28 = vector.load %arg4[%c2, %c0_26, %c0_27] : memref<5x8x8xf32, #tpu.memory_space<vmem>>, vector<1x8x8xf32>
    %29 = vector.shape_cast %28 : vector<1x8x8xf32> to vector<8x8xf32>
    %cst_28 = arith.constant dense<0.000000e+00> : vector<256x8xf32>
    %30 = tpu.matmul %27, %29, %cst_28 {dimension_numbers = #tpu.dot_dimension_numbers<[1], [0], [0], [1], [0, 0, 1, 1], [], []>} : vector<256x8xf32>, vector<8x8xf32>, vector<256x8xf32> -> vector<256x8xf32>
    %31 = arith.addf %26, %30 : vector<256x8xf32>
    %c0_29 = arith.constant 0 : index
    %c0_30 = arith.constant 0 : index
    %32 = vector.load %arg7[%c0_29, %c0_30] : memref<320x8xf32, #tpu.memory_space<vmem>>, vector<256x8xf32>
    %c3 = arith.constant 3 : index
    %c0_31 = arith.constant 0 : index
    %c0_32 = arith.constant 0 : index
    %33 = vector.load %arg4[%c3, %c0_31, %c0_32] : memref<5x8x8xf32, #tpu.memory_space<vmem>>, vector<1x8x8xf32>
    %34 = vector.shape_cast %33 : vector<1x8x8xf32> to vector<8x8xf32>
    %cst_33 = arith.constant dense<0.000000e+00> : vector<256x8xf32>
    %35 = tpu.matmul %32, %34, %cst_33 {dimension_numbers = #tpu.dot_dimension_numbers<[1], [0], [0], [1], [0, 0, 1, 1], [], []>} : vector<256x8xf32>, vector<8x8xf32>, vector<256x8xf32> -> vector<256x8xf32>
    %36 = arith.addf %31, %35 : vector<256x8xf32>
    %c64 = arith.constant 64 : index
    %c0_34 = arith.constant 0 : index
    %37 = vector.load %arg7[%c64, %c0_34] : memref<320x8xf32, #tpu.memory_space<vmem>>, vector<256x8xf32>
    %c4 = arith.constant 4 : index
    %c0_35 = arith.constant 0 : index
    %c0_36 = arith.constant 0 : index
    %38 = vector.load %arg4[%c4, %c0_35, %c0_36] : memref<5x8x8xf32, #tpu.memory_space<vmem>>, vector<1x8x8xf32>
    %39 = vector.shape_cast %38 : vector<1x8x8xf32> to vector<8x8xf32>
    %cst_37 = arith.constant dense<0.000000e+00> : vector<256x8xf32>
    %40 = tpu.matmul %37, %39, %cst_37 {dimension_numbers = #tpu.dot_dimension_numbers<[1], [0], [0], [1], [0, 0, 1, 1], [], []>} : vector<256x8xf32>, vector<8x8xf32>, vector<256x8xf32> -> vector<256x8xf32>
    %41 = arith.addf %36, %40 : vector<256x8xf32>
    %c0_38 = arith.constant 0 : index
    %c0_39 = arith.constant 0 : index
    %42 = vector.load %arg5[%c0_38, %c0_39] : memref<1x8xf32, #tpu.memory_space<vmem>>, vector<1x8xf32>
    %43 = vector.broadcast %42 : vector<1x8xf32> to vector<256x8xf32>
    %44 = arith.addf %41, %43 : vector<256x8xf32>
    %c0_40 = arith.constant 0 : index
    %c0_41 = arith.constant 0 : index
    %c0_42 = arith.constant 0 : index
    %45 = vector.load %arg6[%c0_40, %c0_41, %c0_42] : memref<1x256x8xf32, #tpu.memory_space<vmem>>, vector<1x256x8xf32>
    %46 = vector.shape_cast %45 : vector<1x256x8xf32> to vector<256x8xf32>
    %47 = arith.addf %44, %46 : vector<256x8xf32>
    %c0_43 = arith.constant 0 : index
    %c0_44 = arith.constant 0 : index
    %c0_45 = arith.constant 0 : index
    %48 = vector.load %arg6[%c0_43, %c0_44, %c0_45] : memref<1x256x8xf32, #tpu.memory_space<vmem>>, vector<1x256x8xf32>
    %49 = vector.shape_cast %48 : vector<1x256x8xf32> to vector<256x8xf32>
    %50 = vector.shape_cast %47 : vector<256x8xf32> to vector<1x256x8xf32>
    tpu.vector_store %arg6[%c0_43, %c0_44, %c0_45], %50 {strides = array<i32>} : memref<1x256x8xf32, #tpu.memory_space<vmem>>, vector<1x256x8xf32>,
    return
  }
  func.func @transform_0(%arg0: i32) -> (i32, i32, i32) {
    %c0_i32 = arith.constant 0 : i32
    %c0_i32_0 = arith.constant 0 : i32
    %c0_i32_1 = arith.constant 0 : i32
    return %arg0, %c0_i32, %c0_i32_0 : i32, i32, i32
  }
  func.func @transform_1(%arg0: i32) -> (i32, i32) {
    %c0_i32 = arith.constant 0 : i32
    %c0_i32_0 = arith.constant 0 : i32
    %c0_i32_1 = arith.constant 0 : i32
    return %c0_i32, %c0_i32_0 : i32, i32
  }
  func.func @transform_2(%arg0: i32) -> (i32, i32) {
    %c0_i32 = arith.constant 0 : i32
    %c0_i32_0 = arith.constant 0 : i32
    %c0_i32_1 = arith.constant 0 : i32
    return %c0_i32, %c0_i32_0 : i32, i32
  }
  func.func @transform_3(%arg0: i32) -> (i32, i32, i32) {
    %c0_i32 = arith.constant 0 : i32
    %c0_i32_0 = arith.constant 0 : i32
    %c0_i32_1 = arith.constant 0 : i32
    %c0_i32_2 = arith.constant 0 : i32
    return %c0_i32, %c0_i32_0, %c0_i32_1 : i32, i32, i32
  }
  func.func @transform_4(%arg0: i32) -> (i32, i32) {
    %c0_i32 = arith.constant 0 : i32
    %c0_i32_0 = arith.constant 0 : i32
    %c0_i32_1 = arith.constant 0 : i32
    return %c0_i32, %c0_i32_0 : i32, i32
  }
  func.func @transform_5(%arg0: i32) -> (i32, i32, i32) {
    %c0_i32 = arith.constant 0 : i32
    %c0_i32_0 = arith.constant 0 : i32
    %c0_i32_1 = arith.constant 0 : i32
    return %arg0, %c0_i32, %c0_i32_0 : i32, i32, i32
  }
}

</mosaic_0001>

<bundles_post_ra>
// kernel: tpu_custom_call.1
= control target key start
LH: loop header
LB: loop body
LE: loop exit
PB: predicated region body
PF: predicated region fallthrough
CT: control target
= control target key end

     0   :  { %s3524_s18 = smov 0   ;;  %s4677_s0 = inlined_call_operand.vmem [shape: f32[2,256,4], index: 0, kind: input, shape index: {}]   ;;  %s4678_s1 = inlined_call_operand.vmem [shape: f32[4,16], index: 1, kind: input, shape index: {}]   ;;  %s4679_s2 = inlined_call_operand.vmem [shape: f32[1,16], index: 2, kind: input, shape index: {}]   ;;  %s4680_s3 = inlined_call_operand.vmem [shape: f32[5,8,8], index: 3, kind: input, shape index: {}]   ;;  %s4681_s4 = inlined_call_operand.vmem [shape: f32[1,8], index: 4, kind: input, shape index: {}]   ;;  %s4682_s5 = inlined_call_operand.vmem [shape: f32[2,256,8], index: 5, kind: output, shape index: {}]  }
   0x1 LB: > { %s2764_s19 = sadd.s32 4294967295, %s3490_s18   ;;  %p2768_p0 = scmp.ge.s32.totalorder %s3490_s18, 1  ;;  %s3490_s18 = sphi %s3524_s18, %s15_s18  }
   0x2   : > { %p187_p1 = scmp.lt.s32.totalorder %s3490_s18, 3 }
   0x4   : > { %p188_p2 = pnand %p2768_p0, %p187_p1 }
   0x6   : > { %191 = sbr.rel (%p188_p2) target bundleno = 612 (0x264), region = 40 }
   0xb   : > { %v266_v0 = vld [vmem:[%s4678_s1] sm:$0xf]  ;;  %vm371_vm0 = vcmask 1043456   ;;  %p215_p3 = scmp.lt.s32.totalorder %s2764_s19, 1  ;;  %vm274_vm1 = vcmask 31744   ;;  %vm225_vm2 = vcmask 64512  }
   0xc   : > { %3174 = vmatprep.subr.msk.mxu0 %vm371_vm0, %v266_v0  ;;  %v3492_v33 = vmov 0.0   ;;  %v2807_v34 = vld [vmem:[%s4680_s3 + $0x8] sm:$0xff]  ;;  %v856_v37 = vld [vmem:[%s4680_s3] sm:$0xff]  ;;  %v2872_v38 = vld [vmem:[%s4680_s3 + $0x10] sm:$0xff]  ;;  %s3493_s13 = smov 120  }
   0xd   : > { %3175 = vmatpush3.msk.msra.mxu0 %vm371_vm0, %v266_v0  ;;  %s4798_s19 = smov (!%p215_p3, %s2764_s19), 1  ;;  %228 = vst.msk [vmem:[#allocation2 + $0x10] sm:$0xff] %vm225_vm2, %v3492_v33  ;;  %226 = vst.msk [vmem:[#allocation2] sm:$0xff] %vm225_vm2, %v3492_v33  ;;  %3224 = vmatprep.subr.mxu1 %v2807_v34  ;;  %v2905_v39 = vld [vmem:[%s4680_s3 + $0x18] sm:$0xff]  ;;  %v3640_v40 = vld [vmem:[%s4680_s3 + $0x20] sm:$0xff] }
   0xe   : > { %s2974_s22 = sshll.u32 %s4798_s19, 8  ;;  %227 = vst.msk [vmem:[#allocation2 + $0x8] sm:$0xff] %vm225_vm2, %v3492_v33  ;;  %229 = vst.msk [vmem:[#allocation2 + $0x18] sm:$0xff] %vm225_vm2, %v3492_v33  ;;  %3225 = vmatpush3.msra.mxu1 %v2807_v34  ;;  %3274 = vmatprep.subr.mxu0 %v856_v37  ;;  %v3646_v41 = vld [vmem:[%s4679_s2] ss:$0 sm:$0xff] }
   0xf   : > { %s3543_s25 = scalar_lea.vmem %s4677_s0, %s2974_s22  ;;  %230 = vst.msk [vmem:[#allocation2 + $0x120] sm:$0xff] %vm225_vm2, %v3492_v33  ;;  %231 = vst.msk [vmem:[#allocation2 + $0x128] sm:$0xff] %vm225_vm2, %v3492_v33  ;;  %3324 = vmatprep.subr.mxu1 %v2872_v38  ;;  %s4016_s16 = scalar_lea.vmem %s4682_s5, %s2974_s22 }
  0x10   : > { %v234_v1 = vld [vmem:[%s3543_s25] sm:$0xff]  ;;  %v235_v2 = vld [vmem:[%s3543_s25 + $0x8] sm:$0xff]  ;;  %v236_v3 = vld [vmem:[%s3543_s25 + $0x10] sm:$0xff]  ;;  %232 = vst.msk [vmem:[#allocation2 + $0x130] sm:$0xff] %vm225_vm2, %v3492_v33 }
  0x11   : > { %3176 = vmatprep.mubr.msk.f32.mxu0 %vm274_vm1, %v234_v1  ;;  %v237_v4 = vld [vmem:[%s3543_s25 + $0x18] sm:$0xff]  ;;  %v238_v5 = vld [vmem:[%s3543_s25 + $0x20] sm:$0xff]  ;;  %v239_v6 = vld [vmem:[%s3543_s25 + $0x28] sm:$0xff]  ;;  %233 = vst.msk [vmem:[#allocation2 + $0x138] sm:$0xff] %vm225_vm2, %v3492_v33 }
  0x12   : > { %3177 = vmatmul.mubr.msk.f32.vlgmr.msra.gmra.mxu0 %vm274_vm1, %v235_v2  ;;  %v240_v7 = vld [vmem:[%s3543_s25 + $0x30] sm:$0xff]  ;;  %v241_v8 = vld [vmem:[%s3543_s25 + $0x38] sm:$0xff]  ;;  %v242_v9 = vld [vmem:[%s3543_s25 + $0x40] sm:$0xff] }
  0x13   : > { %3179 = vmatprep.mubr.msk.f32.mxu0 %vm274_vm1, %v236_v3  ;;  %v243_v10 = vld [vmem:[%s3543_s25 + $0x48] sm:$0xff]  ;;  %v244_v11 = vld [vmem:[%s3543_s25 + $0x50] sm:$0xff]  ;;  %v245_v12 = vld [vmem:[%s3543_s25 + $0x58] sm:$0xff]  ;;  %3275 = vmatpush3.msra.mxu0 %v856_v37 }
  0x14   : > { %v246_v13 = vld [vmem:[%s3543_s25 + $0x60] sm:$0xff]  ;;  %v247_v14 = vld [vmem:[%s3543_s25 + $0x68] sm:$0xff]  ;;  %v248_v15 = vld [vmem:[%s3543_s25 + $0x70] sm:$0xff]  ;;  %3374 = vmatprep.subr.mxu0 %v2905_v39 }
  0x15   : > { %v249_v16 = vld [vmem:[%s3543_s25 + $0x78] sm:$0xff]  ;;  %v250_v17 = vld [vmem:[%s3543_s25 + $0x80] sm:$0xff]  ;;  %v251_v18 = vld [vmem:[%s3543_s25 + $0x88] sm:$0xff] }
  0x16   : > { %3180 = vmatmul.mubr.msk.f32.gmra.mxu0 %vm274_vm1, %v237_v4  ;;  %v252_v19 = vld [vmem:[%s3543_s25 + $0x90] sm:$0xff]  ;;  %v253_v20 = vld [vmem:[%s3543_s25 + $0x98] sm:$0xff]  ;;  %v254_v21 = vld [vmem:[%s3543_s25 + $0xa0] sm:$0xff] }
  0x17   : > { %3182 = vmatprep.mubr.msk.f32.mxu0 %vm274_vm1, %v238_v5  ;;  %v255_v22 = vld [vmem:[%s3543_s25 + $0xa8] sm:$0xff]  ;;  %v256_v23 = vld [vmem:[%s3543_s25 + $0xb0] sm:$0xff]  ;;  %v257_v24 = vld [vmem:[%s3543_s25 + $0xb8] sm:$0xff] }
  0x18   : > { %v258_v25 = vld [vmem:[%s3543_s25 + $0xc0] sm:$0xff]  ;;  %v259_v26 = vld [vmem:[%s3543_s25 + $0xc8] sm:$0xff]  ;;  %v260_v27 = vld [vmem:[%s3543_s25 + $0xd0] sm:$0xff] }
  0x19   : > { %v261_v28 = vld [vmem:[%s3543_s25 + $0xd8] sm:$0xff]  ;;  %v262_v29 = vld [vmem:[%s3543_s25 + $0xe0] sm:$0xff]  ;;  %v263_v30 = vld [vmem:[%s3543_s25 + $0xe8] sm:$0xff] }
  0x1a   : > { %3183 = vmatmul.mubr.msk.f32.gmra.mxu0 %vm274_vm1, %v239_v6  ;;  %v264_v31 = vld [vmem:[%s3543_s25 + $0xf0] sm:$0xff]  ;;  %v265_v32 = vld [vmem:[%s3543_s25 + $0xf8] sm:$0xff] }
  0x1b   : > { %3185 = vmatprep.mubr.msk.f32.mxu0 %vm274_vm1, %v240_v7  ;;  %v3620_v35 = vld [vmem:[#allocation2 + $0x10] sm:$0xff]  ;;  %v3624_v36 = vld [vmem:[#allocation2 + $0x18] sm:$0xff] }
  0x1c   : > { %3226 = vmatprep.mubr.msk.f32.mxu1 %vm225_vm2, %v3620_v35 }
  0x1d   : > { %3227 = vmatmul.mubr.msk.f32.vlgmr.msra.gmra.mxu1 %vm225_vm2, %v3624_v36 }
  0x1e   : > { %3186 = vmatmul.mubr.msk.f32.gmra.mxu0 %vm274_vm1, %v241_v8  ;;  %3325 = vmatpush3.msra.mxu1 %v2872_v38 }
  0x1f   : > { %3188 = vmatprep.mubr.msk.f32.mxu0 %vm274_vm1, %v242_v9  ;;  %3424 = vmatprep.subr.mxu1 %v3640_v40 }
  0x22   : > { %3189 = vmatmul.mubr.msk.f32.gmra.mxu0 %vm274_vm1, %v243_v10 }
  0x23   : > { %3191 = vmatprep.mubr.msk.f32.mxu0 %vm274_vm1, %v244_v11 }
  0x26   : > { %3192 = vmatmul.mubr.msk.f32.gmra.mxu0 %vm274_vm1, %v245_v12 }
  0x27   : > { %3194 = vmatprep.mubr.msk.f32.mxu0 %vm274_vm1, %v246_v13 }
  0x2a   : > { %3195 = vmatmul.mubr.msk.f32.gmra.mxu0 %vm274_vm1, %v247_v14 }
  0x2b   : > { %3197 = vmatprep.mubr.msk.f32.mxu0 %vm274_vm1, %v248_v15 }
  0x2e   : > { %3198 = vmatmul.mubr.msk.f32.gmra.mxu0 %vm274_vm1, %v249_v16 }
  0x2f   : > { %3200 = vmatprep.mubr.msk.f32.mxu0 %vm274_vm1, %v250_v17 }
  0x32   : > { %3201 = vmatmul.mubr.msk.f32.gmra.mxu0 %vm274_vm1, %v251_v18 }
  0x33   : > { %3203 = vmatprep.mubr.msk.f32.mxu0 %vm274_vm1, %v252_v19 }
  0x36   : > { %3204 = vmatmul.mubr.msk.f32.gmra.mxu0 %vm274_vm1, %v253_v20 }
  0x37   : > { %3206 = vmatprep.mubr.msk.f32.mxu0 %vm274_vm1, %v254_v21 }
  0x3a   : > { %3207 = vmatmul.mubr.msk.f32.gmra.mxu0 %vm274_vm1, %v255_v22 }
  0x3b   : > { %3209 = vmatprep.mubr.msk.f32.mxu0 %vm274_vm1, %v256_v23 }
  0x3e   : > { %3210 = vmatmul.mubr.msk.f32.gmra.mxu0 %vm274_vm1, %v257_v24 }
  0x3f   : > { %3212 = vmatprep.mubr.msk.f32.mxu0 %vm274_vm1, %v258_v25 }
  0x42   : > { %3213 = vmatmul.mubr.msk.f32.gmra.mxu0 %vm274_vm1, %v259_v26 }
  0x43   : > { %3215 = vmatprep.mubr.msk.f32.mxu0 %vm274_vm1, %v260_v27 }
  0x46   : > { %3216 = vmatmul.mubr.msk.f32.gmra.mxu0 %vm274_vm1, %v261_v28 }
  0x47   : > { %3218 = vmatprep.mubr.msk.f32.mxu0 %vm274_vm1, %v262_v29 }
  0x4a   : > { %3219 = vmatmul.mubr.msk.f32.gmra.mxu0 %vm274_vm1, %v263_v30 }
  0x4b   : > { %3221 = vmatprep.mubr.msk.f32.mxu0 %vm274_vm1, %v264_v31 }
  0x4e   : > { %3222 = vmatmul.mubr.msk.f32.gmra.mxu0 %vm274_vm1, %v265_v32 }
  0xd2   : > { %v3178_v42 = vpop.f32.mrf.mxu0 }
  0xd3   : > { %v447_v43 = vadd.f32 %v3178_v42, %v3646_v41 }
  0xd4   : > { %v441_v44 = vpop.f32.mrf.mxu0 }
  0xd5   : > { %v601_v45 = vmax.f32 %v447_v43, 0.0  ;;  %v442_v46 = vadd.f32 %v3646_v41, %v441_v44  ;;  %666 = vrot.lane.b32.xlu0 %v447_v43, %s3493_s13 }
  0xd6   : > { %v3181_v47 = vpop.f32.mrf.mxu0 }
  0xd7   : > { %793 = vst.msk [vmem:[#allocation2 + $0x28] sm:$0xff] %vm225_vm2, %v601_v45  ;;  %v600_v48 = vmax.f32 %v442_v46, 0.0  ;;  %v457_v49 = vadd.f32 %v3181_v47, %v3646_v41 }
  0xd8   : > { %v451_v50 = vpop.f32.mrf.mxu0 }
  0xd9   : > { %792 = vst.msk [vmem:[#allocation2 + $0x20] sm:$0xff] %vm225_vm2, %v600_v48  ;;  %v603_v51 = vmax.f32 %v457_v49, 0.0  ;;  %v452_v52 = vadd.f32 %v3646_v41, %v451_v50  ;;  %670 = vrot.lane.b32.xlu1 %v457_v49, %s3493_s13  ;;  %664 = vrot.lane.b32.xlu0 %v442_v46, %s3493_s13 }
  0xda   : > { %v3184_v53 = vpop.f32.mrf.mxu0 }
  0xdb   : > { %795 = vst.msk [vmem:[#allocation2 + $0x38] sm:$0xff] %vm225_vm2, %v603_v51  ;;  %v602_v54 = vmax.f32 %v452_v52, 0.0  ;;  %v467_v55 = vadd.f32 %v3184_v53, %v3646_v41 }
  0xdc   : > { %v461_v56 = vpop.f32.mrf.mxu0 }
  0xdd   : > { %794 = vst.msk [vmem:[#allocation2 + $0x30] sm:$0xff] %vm225_vm2, %v602_v54  ;;  %v605_v57 = vmax.f32 %v467_v55, 0.0  ;;  %v462_v58 = vadd.f32 %v3646_v41, %v461_v56  ;;  %668 = vrot.lane.b32.xlu1 %v452_v52, %s3493_s13 }
  0xde   : > { %v3187_v59 = vpop.f32.mrf.mxu0  ;;  %v3672_v2 = vld [vmem:[#allocation2 + $0x28] sm:$0xff] }
  0xdf   : > { %797 = vst.msk [vmem:[#allocation2 + $0x48] sm:$0xff] %vm225_vm2, %v605_v57  ;;  %v604_v60 = vmax.f32 %v462_v58, 0.0  ;;  %v477_v61 = vadd.f32 %v3187_v59, %v3646_v41  ;;  %672 = vrot.lane.b32.xlu0 %v462_v58, %s3493_s13 }
  0xe0   : > { %v471_v62 = vpop.f32.mrf.mxu0  ;;  %v3665_v63 = vld [vmem:[#allocation2 + $0x20] sm:$0xff] }
  0xe1   : > { %796 = vst.msk [vmem:[#allocation2 + $0x40] sm:$0xff] %vm225_vm2, %v604_v60  ;;  %v607_v0 = vmax.f32 %v477_v61, 0.0  ;;  %v472_v1 = vadd.f32 %v3646_v41, %v471_v62  ;;  %674 = vrot.lane.b32.xlu1 %v467_v55, %s3493_s13  ;;  %3229 = vmatprep.mubr.msk.f32.mxu1 %vm225_vm2, %v3665_v63 }
  0xe2   : > { %3276 = vmatprep.mubr.msk.f32.mxu0 %vm225_vm2, %v3665_v63  ;;  %v3190_v3 = vpop.f32.mrf.mxu0  ;;  %3230 = vmatmul.mubr.msk.f32.gmra.mxu1 %vm225_vm2, %v3672_v2  ;;  %v3690_v10 = vld [vmem:[#allocation2 + $0x38] sm:$0xff] }
  0xe3   : > { %799 = vst.msk [vmem:[#allocation2 + $0x58] sm:$0xff] %vm225_vm2, %v607_v0  ;;  %v606_v4 = vmax.f32 %v472_v1, 0.0  ;;  %v487_v5 = vadd.f32 %v3190_v3, %v3646_v41  ;;  %3277 = vmatmul.mubr.msk.f32.vlgmr.msra.gmra.mxu0 %vm225_vm2, %v3672_v2  ;;  %676 = vrot.lane.b32.xlu0 %v472_v1, %s3493_s13 }
  0xe4   : > { %v481_v6 = vpop.f32.mrf.mxu0  ;;  %v3683_v7 = vld [vmem:[#allocation2 + $0x30] sm:$0xff]  ;;  %3375 = vmatpush3.msra.mxu0 %v2905_v39 }
  0xe5   : > { %798 = vst.msk [vmem:[#allocation2 + $0x50] sm:$0xff] %vm225_vm2, %v606_v4  ;;  %v609_v8 = vmax.f32 %v487_v5, 0.0  ;;  %v482_v9 = vadd.f32 %v3646_v41, %v481_v6  ;;  %678 = vrot.lane.b32.xlu1 %v477_v61, %s3493_s13  ;;  %3232 = vmatprep.mubr.msk.f32.mxu1 %vm225_vm2, %v3683_v7 }
  0xe6   : > { %3279 = vmatprep.mubr.msk.f32.mxu0 %vm225_vm2, %v3683_v7  ;;  %v3193_v11 = vpop.f32.mrf.mxu0  ;;  %3233 = vmatmul.mubr.msk.f32.gmra.mxu1 %vm225_vm2, %v3690_v10  ;;  %v3708_v18 = vld [vmem:[#allocation2 + $0x48] sm:$0xff] }
  0xe7   : > { %801 = vst.msk [vmem:[#allocation2 + $0x68] sm:$0xff] %vm225_vm2, %v609_v8  ;;  %v608_v12 = vmax.f32 %v482_v9, 0.0  ;;  %v497_v13 = vadd.f32 %v3193_v11, %v3646_v41  ;;  %3280 = vmatmul.mubr.msk.f32.gmra.mxu0 %vm225_vm2, %v3690_v10  ;;  %680 = vrot.lane.b32.xlu0 %v482_v9, %s3493_s13 }
  0xe8   : > { %v491_v14 = vpop.f32.mrf.mxu0  ;;  %v3701_v15 = vld [vmem:[#allocation2 + $0x40] sm:$0xff] }
  0xe9   : > { %800 = vst.msk [vmem:[#allocation2 + $0x60] sm:$0xff] %vm225_vm2, %v608_v12  ;;  %v611_v16 = vmax.f32 %v497_v13, 0.0  ;;  %v492_v17 = vadd.f32 %v3646_v41, %v491_v14  ;;  %682 = vrot.lane.b32.xlu1 %v487_v5, %s3493_s13  ;;  %3235 = vmatprep.mubr.msk.f32.mxu1 %vm225_vm2, %v3701_v15 }
  0xea   : > { %3282 = vmatprep.mubr.msk.f32.mxu0 %vm225_vm2, %v3701_v15  ;;  %v3196_v19 = vpop.f32.mrf.mxu0  ;;  %3236 = vmatmul.mubr.msk.f32.gmra.mxu1 %vm225_vm2, %v3708_v18  ;;  %v3726_v26 = vld [vmem:[#allocation2 + $0x58] sm:$0xff] }
  0xeb   : > { %803 = vst.msk [vmem:[#allocation2 + $0x78] sm:$0xff] %vm225_vm2, %v611_v16  ;;  %v610_v20 = vmax.f32 %v492_v17, 0.0  ;;  %v507_v21 = vadd.f32 %v3196_v19, %v3646_v41  ;;  %3283 = vmatmul.mubr.msk.f32.gmra.mxu0 %vm225_vm2, %v3708_v18  ;;  %684 = vrot.lane.b32.xlu0 %v492_v17, %s3493_s13 }
  0xec   : > { %v501_v22 = vpop.f32.mrf.mxu0  ;;  %v3719_v23 = vld [vmem:[#allocation2 + $0x50] sm:$0xff] }
  0xed   : > { %802 = vst.msk [vmem:[#allocation2 + $0x70] sm:$0xff] %vm225_vm2, %v610_v20  ;;  %v613_v24 = vmax.f32 %v507_v21, 0.0  ;;  %v502_v25 = vadd.f32 %v3646_v41, %v501_v22  ;;  %686 = vrot.lane.b32.xlu1 %v497_v13, %s3493_s13  ;;  %3238 = vmatprep.mubr.msk.f32.mxu1 %vm225_vm2, %v3719_v23 }
  0xee   : > { %3285 = vmatprep.mubr.msk.f32.mxu0 %vm225_vm2, %v3719_v23  ;;  %v3199_v27 = vpop.f32.mrf.mxu0  ;;  %3239 = vmatmul.mubr.msk.f32.gmra.mxu1 %vm225_vm2, %v3726_v26  ;;  %v3744_v34 = vld [vmem:[#allocation2 + $0x68] sm:$0xff] }
  0xef   : > { %805 = vst.msk [vmem:[#allocation2 + $0x88] sm:$0xff] %vm225_vm2, %v613_v24  ;;  %v612_v28 = vmax.f32 %v502_v25, 0.0  ;;  %v517_v29 = vadd.f32 %v3199_v27, %v3646_v41  ;;  %3286 = vmatmul.mubr.msk.f32.gmra.mxu0 %vm225_vm2, %v3726_v26  ;;  %688 = vrot.lane.b32.xlu0 %v502_v25, %s3493_s13 }
  0xf0   : > { %v511_v30 = vpop.f32.mrf.mxu0  ;;  %v3737_v31 = vld [vmem:[#allocation2 + $0x60] sm:$0xff] }
  0xf1   : > { %804 = vst.msk [vmem:[#allocation2 + $0x80] sm:$0xff] %vm225_vm2, %v612_v28  ;;  %v615_v32 = vmax.f32 %v517_v29, 0.0  ;;  %v512_v33 = vadd.f32 %v3646_v41, %v511_v30  ;;  %690 = vrot.lane.b32.xlu1 %v507_v21, %s3493_s13  ;;  %3241 = vmatprep.mubr.msk.f32.mxu1 %vm225_vm2, %v3737_v31 }
  0xf2   : > { %3288 = vmatprep.mubr.msk.f32.mxu0 %vm225_vm2, %v3737_v31  ;;  %v3202_v37 = vpop.f32.mrf.mxu0  ;;  %3242 = vmatmul.mubr.msk.f32.gmra.mxu1 %vm225_vm2, %v3744_v34  ;;  %v3762_v46 = vld [vmem:[#allocation2 + $0x78] sm:$0xff] }
  0xf3   : > { %807 = vst.msk [vmem:[#allocation2 + $0x98] sm:$0xff] %vm225_vm2, %v615_v32  ;;  %v614_v38 = vmax.f32 %v512_v33, 0.0  ;;  %v527_v39 = vadd.f32 %v3202_v37, %v3646_v41  ;;  %3289 = vmatmul.mubr.msk.f32.gmra.mxu0 %vm225_vm2, %v3744_v34  ;;  %692 = vrot.lane.b32.xlu0 %v512_v33, %s3493_s13 }
  0xf4   : > { %v521_v42 = vpop.f32.mrf.mxu0  ;;  %v3755_v43 = vld [vmem:[#allocation2 + $0x70] sm:$0xff] }
  0xf5   : > { %806 = vst.msk [vmem:[#allocation2 + $0x90] sm:$0xff] %vm225_vm2, %v614_v38  ;;  %v617_v44 = vmax.f32 %v527_v39, 0.0  ;;  %v522_v45 = vadd.f32 %v3646_v41, %v521_v42  ;;  %694 = vrot.lane.b32.xlu1 %v517_v29, %s3493_s13  ;;  %3244 = vmatprep.mubr.msk.f32.mxu1 %vm225_vm2, %v3755_v43 }
  0xf6   : > { %3291 = vmatprep.mubr.msk.f32.mxu0 %vm225_vm2, %v3755_v43  ;;  %v3205_v47 = vpop.f32.mrf.mxu0  ;;  %3245 = vmatmul.mubr.msk.f32.gmra.mxu1 %vm225_vm2, %v3762_v46  ;;  %v3780_v54 = vld [vmem:[#allocation2 + $0x88] sm:$0xff] }
  0xf7   : > { %809 = vst.msk [vmem:[#allocation2 + $0xa8] sm:$0xff] %vm225_vm2, %v617_v44  ;;  %v616_v48 = vmax.f32 %v522_v45, 0.0  ;;  %v537_v49 = vadd.f32 %v3205_v47, %v3646_v41  ;;  %3292 = vmatmul.mubr.msk.f32.gmra.mxu0 %vm225_vm2, %v3762_v46  ;;  %696 = vrot.lane.b32.xlu0 %v522_v45, %s3493_s13 }
  0xf8   : > { %v531_v50 = vpop.f32.mrf.mxu0  ;;  %v3773_v51 = vld [vmem:[#allocation2 + $0x80] sm:$0xff] }
  0xf9   : > { %808 = vst.msk [vmem:[#allocation2 + $0xa0] sm:$0xff] %vm225_vm2, %v616_v48  ;;  %v619_v52 = vmax.f32 %v537_v49, 0.0  ;;  %v532_v53 = vadd.f32 %v3646_v41, %v531_v50  ;;  %698 = vrot.lane.b32.xlu1 %v527_v39, %s3493_s13  ;;  %3247 = vmatprep.mubr.msk.f32.mxu1 %vm225_vm2, %v3773_v51 }
  0xfa   : > { %3294 = vmatprep.mubr.msk.f32.mxu0 %vm225_vm2, %v3773_v51  ;;  %v3208_v55 = vpop.f32.mrf.mxu0  ;;  %3248 = vmatmul.mubr.msk.f32.gmra.mxu1 %vm225_vm2, %v3780_v54  ;;  %v3798_v62 = vld [vmem:[#allocation2 + $0x98] sm:$0xff] }
  0xfb   : > { %811 = vst.msk [vmem:[#allocation2 + $0xb8] sm:$0xff] %vm225_vm2, %v619_v52  ;;  %v618_v56 = vmax.f32 %v532_v53, 0.0  ;;  %v547_v57 = vadd.f32 %v3208_v55, %v3646_v41  ;;  %3295 = vmatmul.mubr.msk.f32.gmra.mxu0 %vm225_vm2, %v3780_v54  ;;  %700 = vrot.lane.b32.xlu0 %v532_v53, %s3493_s13 }
  0xfc   : > { %v541_v58 = vpop.f32.mrf.mxu0  ;;  %v3791_v59 = vld [vmem:[#allocation2 + $0x90] sm:$0xff] }
  0xfd   : > { %810 = vst.msk [vmem:[#allocation2 + $0xb0] sm:$0xff] %vm225_vm2, %v618_v56  ;;  %v621_v60 = vmax.f32 %v547_v57, 0.0  ;;  %v542_v61 = vadd.f32 %v3646_v41, %v541_v58  ;;  %702 = vrot.lane.b32.xlu1 %v537_v49, %s3493_s13  ;;  %3250 = vmatprep.mubr.msk.f32.mxu1 %vm225_vm2, %v3791_v59 }
  0xfe   : > { %3297 = vmatprep.mubr.msk.f32.mxu0 %vm225_vm2, %v3791_v59  ;;  %v3211_v0 = vpop.f32.mrf.mxu0  ;;  %3251 = vmatmul.mubr.msk.f32.gmra.mxu1 %vm225_vm2, %v3798_v62  ;;  %v3816_v9 = vld [vmem:[#allocation2 + $0xa8] sm:$0xff] }
  0xff   : > { %813 = vst.msk [vmem:[#allocation2 + $0xc8] sm:$0xff] %vm225_vm2, %v621_v60  ;;  %v620_v1 = vmax.f32 %v542_v61, 0.0  ;;  %v557_v3 = vadd.f32 %v3211_v0, %v3646_v41  ;;  %3298 = vmatmul.mubr.msk.f32.gmra.mxu0 %vm225_vm2, %v3798_v62  ;;  %704 = vrot.lane.b32.xlu0 %v542_v61, %s3493_s13 }
 0x100   : > { %v551_v4 = vpop.f32.mrf.mxu0  ;;  %v3809_v5 = vld [vmem:[#allocation2 + $0xa0] sm:$0xff] }
 0x101   : > { %812 = vst.msk [vmem:[#allocation2 + $0xc0] sm:$0xff] %vm225_vm2, %v620_v1  ;;  %v623_v6 = vmax.f32 %v557_v3, 0.0  ;;  %v552_v8 = vadd.f32 %v3646_v41, %v551_v4  ;;  %706 = vrot.lane.b32.xlu1 %v547_v57, %s3493_s13  ;;  %3253 = vmatprep.mubr.msk.f32.mxu1 %vm225_vm2, %v3809_v5  ;;  %v1801_v4 = vld [vmem:[#allocation2 + $0x8] sm:$0xff] }
 0x102   : > { %3300 = vmatprep.mubr.msk.f32.mxu0 %vm225_vm2, %v3809_v5  ;;  %v3214_v11 = vpop.f32.mrf.mxu0  ;;  %3254 = vmatmul.mubr.msk.f32.gmra.mxu1 %vm225_vm2, %v3816_v9  ;;  %v3834_v20 = vld [vmem:[#allocation2 + $0xb8] sm:$0xff] }
 0x103   : > { %815 = vst.msk [vmem:[#allocation2 + $0xd8] sm:$0xff] %vm225_vm2, %v623_v6  ;;  %v622_v12 = vmax.f32 %v552_v8, 0.0  ;;  %v567_v13 = vadd.f32 %v3214_v11, %v3646_v41  ;;  %3301 = vmatmul.mubr.msk.f32.gmra.mxu0 %vm225_vm2, %v3816_v9  ;;  %708 = vrot.lane.b32.xlu0 %v552_v8, %s3493_s13  ;;  %v4072_v11 = vld [vmem:[#allocation2 + $0x128] sm:$0xff] }
 0x104   : > { %v561_v14 = vpop.f32.mrf.mxu0  ;;  %v3827_v16 = vld [vmem:[#allocation2 + $0xb0] sm:$0xff] }
 0x105   : > { %814 = vst.msk [vmem:[#allocation2 + $0xd0] sm:$0xff] %vm225_vm2, %v622_v12  ;;  %v625_v17 = vmax.f32 %v567_v13, 0.0  ;;  %v562_v19 = vadd.f32 %v3646_v41, %v561_v14  ;;  %710 = vrot.lane.b32.xlu1 %v557_v3, %s3493_s13  ;;  %3256 = vmatprep.mubr.msk.f32.mxu1 %vm225_vm2, %v3827_v16  ;;  %v1800_v3 = vld [vmem:[#allocation2] sm:$0xff] }
 0x106   : > { %3303 = vmatprep.mubr.msk.f32.mxu0 %vm225_vm2, %v3827_v16  ;;  %v3217_v21 = vpop.f32.mrf.mxu0  ;;  %3257 = vmatmul.mubr.msk.f32.gmra.mxu1 %vm225_vm2, %v3834_v20  ;;  %v3852_v30 = vld [vmem:[#allocation2 + $0xc8] sm:$0xff] }
 0x107   : > { %817 = vst.msk [vmem:[#allocation2 + $0xe8] sm:$0xff] %vm225_vm2, %v625_v17  ;;  %v624_v22 = vmax.f32 %v562_v19, 0.0  ;;  %v577_v24 = vadd.f32 %v3217_v21, %v3646_v41  ;;  %3304 = vmatmul.mubr.msk.f32.gmra.mxu0 %vm225_vm2, %v3834_v20  ;;  %712 = vrot.lane.b32.xlu0 %v562_v19, %s3493_s13 }
 0x108   : > { %v571_v25 = vpop.f32.mrf.mxu0  ;;  %v3845_v27 = vld [vmem:[#allocation2 + $0xc0] sm:$0xff] }
 0x109   : > { %816 = vst.msk [vmem:[#allocation2 + $0xe0] sm:$0xff] %vm225_vm2, %v624_v22  ;;  %v627_v28 = vmax.f32 %v577_v24, 0.0  ;;  %v572_v29 = vadd.f32 %v3646_v41, %v571_v25  ;;  %714 = vrot.lane.b32.xlu1 %v567_v13, %s3493_s13  ;;  %3259 = vmatprep.mubr.msk.f32.mxu1 %vm225_vm2, %v3845_v27  ;;  %v2217_v25 = vld [vmem:[#allocation2 + $0x130] sm:$0xff] }
 0x10a   : > { %3306 = vmatprep.mubr.msk.f32.mxu0 %vm225_vm2, %v3845_v27  ;;  %v3220_v32 = vpop.f32.mrf.mxu0  ;;  %3260 = vmatmul.mubr.msk.f32.gmra.mxu1 %vm225_vm2, %v3852_v30  ;;  %v3870_v45 = vld [vmem:[#allocation2 + $0xd8] sm:$0xff] }
 0x10b   : > { %819 = vst.msk [vmem:[#allocation2 + $0xf8] sm:$0xff] %vm225_vm2, %v627_v28  ;;  %v626_v33 = vmax.f32 %v572_v29, 0.0  ;;  %v587_v37 = vadd.f32 %v3220_v32, %v3646_v41  ;;  %3307 = vmatmul.mubr.msk.f32.gmra.mxu0 %vm225_vm2, %v3852_v30  ;;  %716 = vrot.lane.b32.xlu0 %v572_v29, %s3493_s13  ;;  %v4196_v28 = vpop.f32.mrf.mxu1 }
 0x10c   : > { %v581_v38 = vpop.f32.mrf.mxu0  ;;  %v3863_v39 = vld [vmem:[#allocation2 + $0xd0] sm:$0xff] }
 0x10d   : > { %818 = vst.msk [vmem:[#allocation2 + $0xf0] sm:$0xff] %vm225_vm2, %v626_v33  ;;  %v629_v42 = vmax.f32 %v587_v37, 0.0  ;;  %v582_v44 = vadd.f32 %v3646_v41, %v581_v38  ;;  %718 = vrot.lane.b32.xlu1 %v577_v24, %s3493_s13  ;;  %3262 = vmatprep.mubr.msk.f32.mxu1 %vm225_vm2, %v3863_v39  ;;  %v4198_v29 = vpop.f32.mrf.mxu1 }
 0x10e   : > { %3309 = vmatprep.mubr.msk.f32.mxu0 %vm225_vm2, %v3863_v39  ;;  %v3223_v47 = vpop.f32.mrf.mxu0  ;;  %3263 = vmatmul.mubr.msk.f32.gmra.mxu1 %vm225_vm2, %v3870_v45  ;;  %v3888_v56 = vld [vmem:[#allocation2 + $0xe8] sm:$0xff] }
 0x10f   : > { %821 = vst.msk [vmem:[#allocation2 + $0x108] sm:$0xff] %vm225_vm2, %v629_v42  ;;  %v628_v48 = vmax.f32 %v582_v44, 0.0  ;;  %v597_v49 = vadd.f32 %v3223_v47, %v3646_v41  ;;  %3310 = vmatmul.mubr.msk.f32.gmra.mxu0 %vm225_vm2, %v3870_v45  ;;  %720 = vrot.lane.b32.xlu0 %v582_v44, %s3493_s13 }
 0x110   : > { %v591_v50 = vpop.f32.mrf.mxu0  ;;  %v3881_v52 = vld [vmem:[#allocation2 + $0xe0] sm:$0xff] }
 0x111   : > { %820 = vst.msk [vmem:[#allocation2 + $0x100] sm:$0xff] %vm225_vm2, %v628_v48  ;;  %v631_v53 = vmax.f32 %v597_v49, 0.0  ;;  %v592_v55 = vadd.f32 %v3646_v41, %v591_v50  ;;  %722 = vrot.lane.b32.xlu1 %v587_v37, %s3493_s13  ;;  %3265 = vmatprep.mubr.msk.f32.mxu1 %vm225_vm2, %v3881_v52 }
 0x112   : > { %3312 = vmatprep.mubr.msk.f32.mxu0 %vm225_vm2, %v3881_v52  ;;  %3266 = vmatmul.mubr.msk.f32.gmra.mxu1 %vm225_vm2, %v3888_v56  ;;  %v3905_v58 = vld [vmem:[#allocation2 + $0xf8] sm:$0xff] }
 0x113   : > { %823 = vst.msk [vmem:[#allocation2 + $0x118] sm:$0xff] %vm225_vm2, %v631_v53  ;;  %v630_v57 = vmax.f32 %v592_v55, 0.0  ;;  %3313 = vmatmul.mubr.msk.f32.gmra.mxu0 %vm225_vm2, %v3888_v56  ;;  %724 = vrot.lane.b32.xlu0 %v592_v55, %s3493_s13 }
 0x114   : > { %v3898_v41 = vld [vmem:[#allocation2 + $0xf0] sm:$0xff] }
 0x115   : > { %822 = vst.msk [vmem:[#allocation2 + $0x110] sm:$0xff] %vm225_vm2, %v630_v57  ;;  %3268 = vmatprep.mubr.msk.f32.mxu1 %vm225_vm2, %v3898_v41  ;;  %3315 = vmatprep.mubr.msk.f32.mxu0 %vm225_vm2, %v3898_v41 }
 0x116   : > { %3269 = vmatmul.mubr.msk.f32.gmra.mxu1 %vm225_vm2, %v3905_v58  ;;  %726 = vrot.lane.b32.xlu1 %v597_v49, %s3493_s13  ;;  %v3918_v61 = vld [vmem:[#allocation2 + $0x108] sm:$0xff] }
 0x117   : > { %3316 = vmatmul.mubr.msk.f32.gmra.mxu0 %vm225_vm2, %v3905_v58 }
 0x118   : > { %v3912_v60 = vld [vmem:[#allocation2 + $0x100] sm:$0xff] }
 0x119   : > { %3271 = vmatprep.mubr.msk.f32.mxu1 %vm225_vm2, %v3912_v60  ;;  %3318 = vmatprep.mubr.msk.f32.mxu0 %vm225_vm2, %v3912_v60 }
 0x11a   : > { %3272 = vmatmul.mubr.msk.f32.gmra.mxu1 %vm225_vm2, %v3918_v61  ;;  %v3928_v1 = vld [vmem:[#allocation2 + $0x118] sm:$0xff] }
 0x11b   : > { %3319 = vmatmul.mubr.msk.f32.gmra.mxu0 %vm225_vm2, %v3918_v61  ;;  %3326 = vmatprep.mubr.msk.f32.mxu1 %vm225_vm2, %v3683_v7 }
 0x11c   : > { %v3926_v0 = vld [vmem:[#allocation2 + $0x110] sm:$0xff] }
 0x11d   : > { %3321 = vmatprep.mubr.msk.f32.mxu0 %vm225_vm2, %v3926_v0 }
 0x11e   : > { %3327 = vmatmul.mubr.msk.f32.vlgmr.msra.gmra.mxu1 %vm225_vm2, %v3690_v10 }
 0x11f   : > { %3322 = vmatmul.mubr.msk.f32.gmra.mxu0 %vm225_vm2, %v3928_v1  ;;  %3425 = vmatpush3.msra.mxu1 %v3640_v40 }
 0x120   : > { %3329 = vmatprep.mubr.msk.f32.mxu1 %vm225_vm2, %v3701_v15  ;;  %3376 = vmatprep.mubr.msk.f32.mxu0 %vm225_vm2, %v1800_v3 }
 0x122   : > { %3330 = vmatmul.mubr.msk.f32.gmra.mxu1 %vm225_vm2, %v3708_v18 }
 0x123   : > { %3377 = vmatmul.mubr.msk.f32.vlgmr.msra.gmra.mxu0 %vm225_vm2, %v1801_v4  ;;  %3332 = vmatprep.mubr.msk.f32.mxu1 %vm225_vm2, %v3719_v23 }
 0x124   : > { %3379 = vmatprep.mubr.msk.f32.mxu0 %vm225_vm2, %v3620_v35 }
 0x126   : > { %3333 = vmatmul.mubr.msk.f32.gmra.mxu1 %vm225_vm2, %v3726_v26 }
 0x127   : > { %3380 = vmatmul.mubr.msk.f32.gmra.mxu0 %vm225_vm2, %v3624_v36  ;;  %3335 = vmatprep.mubr.msk.f32.mxu1 %vm225_vm2, %v3737_v31 }
 0x128   : > { %3382 = vmatprep.mubr.msk.f32.mxu0 %vm225_vm2, %v3665_v63 }
 0x12a   : > { %3336 = vmatmul.mubr.msk.f32.gmra.mxu1 %vm225_vm2, %v3744_v34 }
 0x12b   : > { %3383 = vmatmul.mubr.msk.f32.gmra.mxu0 %vm225_vm2, %v3672_v2  ;;  %3338 = vmatprep.mubr.msk.f32.mxu1 %vm225_vm2, %v3755_v43 }
 0x12c   : > { %3385 = vmatprep.mubr.msk.f32.mxu0 %vm225_vm2, %v3683_v7 }
 0x12e   : > { %3339 = vmatmul.mubr.msk.f32.gmra.mxu1 %vm225_vm2, %v3762_v46 }
 0x12f   : > { %3386 = vmatmul.mubr.msk.f32.gmra.mxu0 %vm225_vm2, %v3690_v10  ;;  %3341 = vmatprep.mubr.msk.f32.mxu1 %vm225_vm2, %v3773_v51  ;;  %v4062_v10 = vld [vmem:[#allocation2 + $0x120] sm:$0xff] }
 0x130   : > { %3388 = vmatprep.mubr.msk.f32.mxu0 %vm225_vm2, %v3701_v15 }
 0x132   : > { %3342 = vmatmul.mubr.msk.f32.gmra.mxu1 %vm225_vm2, %v3780_v54 }
 0x133   : > { %3389 = vmatmul.mubr.msk.f32.gmra.mxu0 %vm225_vm2, %v3708_v18  ;;  %3344 = vmatprep.mubr.msk.f32.mxu1 %vm225_vm2, %v3791_v59 }
 0x134   : > { %3391 = vmatprep.mubr.msk.f32.mxu0 %vm225_vm2, %v3719_v23 }
 0x136   : > { %3345 = vmatmul.mubr.msk.f32.gmra.mxu1 %vm225_vm2, %v3798_v62 }
 0x137   : > { %3392 = vmatmul.mubr.msk.f32.gmra.mxu0 %vm225_vm2, %v3726_v26  ;;  %3347 = vmatprep.mubr.msk.f32.mxu1 %vm225_vm2, %v3809_v5 }
 0x138   : > { %3394 = vmatprep.mubr.msk.f32.mxu0 %vm225_vm2, %v3737_v31 }
 0x13a   : > { %3348 = vmatmul.mubr.msk.f32.gmra.mxu1 %vm225_vm2, %v3816_v9 }
 0x13b   : > { %3395 = vmatmul.mubr.msk.f32.gmra.mxu0 %vm225_vm2, %v3744_v34  ;;  %3350 = vmatprep.mubr.msk.f32.mxu1 %vm225_vm2, %v3827_v16 }
 0x13c   : > { %3397 = vmatprep.mubr.msk.f32.mxu0 %vm225_vm2, %v3755_v43 }
 0x13e   : > { %3351 = vmatmul.mubr.msk.f32.gmra.mxu1 %vm225_vm2, %v3834_v20 }
 0x13f   : > { %3398 = vmatmul.mubr.msk.f32.gmra.mxu0 %vm225_vm2, %v3762_v46  ;;  %3353 = vmatprep.mubr.msk.f32.mxu1 %vm225_vm2, %v3845_v27 }
 0x140   : > { %3400 = vmatprep.mubr.msk.f32.mxu0 %vm225_vm2, %v3773_v51 }
 0x142   : > { %3354 = vmatmul.mubr.msk.f32.gmra.mxu1 %vm225_vm2, %v3852_v30 }
 0x143   : > { %3401 = vmatmul.mubr.msk.f32.gmra.mxu0 %vm225_vm2, %v3780_v54  ;;  %3356 = vmatprep.mubr.msk.f32.mxu1 %vm225_vm2, %v3863_v39 }
 0x144   : > { %3403 = vmatprep.mubr.msk.f32.mxu0 %vm225_vm2, %v3791_v59 }
 0x146   : > { %3357 = vmatmul.mubr.msk.f32.gmra.mxu1 %vm225_vm2, %v3870_v45 }
 0x147   : > { %3404 = vmatmul.mubr.msk.f32.gmra.mxu0 %vm225_vm2, %v3798_v62  ;;  %v667_v35 = vpop.permute.xlu0 %666  ;;  %3359 = vmatprep.mubr.msk.f32.mxu1 %vm225_vm2, %v3881_v52 }
 0x148   : > { %761 = vst.msk [vmem:[%s4016_s16 + $0x8] sm:$0xff] %vm225_vm2, %v667_v35  ;;  %3406 = vmatprep.mubr.msk.f32.mxu0 %vm225_vm2, %v3809_v5 }
 0x14a   : > { %3360 = vmatmul.mubr.msk.f32.gmra.mxu1 %vm225_vm2, %v3888_v56 }
 0x14b   : > { %3407 = vmatmul.mubr.msk.f32.gmra.mxu0 %vm225_vm2, %v3816_v9  ;;  %v671_v36 = vpop.permute.xlu1 %670  ;;  %v665_v40 = vpop.permute.xlu0 %664  ;;  %3362 = vmatprep.mubr.msk.f32.mxu1 %vm225_vm2, %v3898_v41 }
 0x14c   : > { %763 = vst.msk [vmem:[%s4016_s16 + $0x18] sm:$0xff] %vm225_vm2, %v671_v36  ;;  %760 = vst.msk [vmem:[%s4016_s16] sm:$0xff] %vm225_vm2, %v665_v40  ;;  %3409 = vmatprep.mubr.msk.f32.mxu0 %vm225_vm2, %v3827_v16 }
 0x14e   : > { %3363 = vmatmul.mubr.msk.f32.gmra.mxu1 %vm225_vm2, %v3905_v58 }
 0x14f   : > { %3410 = vmatmul.mubr.msk.f32.gmra.mxu0 %vm225_vm2, %v3834_v20  ;;  %v669_v63 = vpop.permute.xlu1 %668  ;;  %3365 = vmatprep.mubr.msk.f32.mxu1 %vm225_vm2, %v3912_v60 }
 0x150   : > { %762 = vst.msk [vmem:[%s4016_s16 + $0x10] sm:$0xff] %vm225_vm2, %v669_v63  ;;  %3412 = vmatprep.mubr.msk.f32.mxu0 %vm225_vm2, %v3845_v27 }
 0x151   : > { %v673_v2 = vpop.permute.xlu0 %672 }
 0x152   : > { %764 = vst.msk [vmem:[%s4016_s16 + $0x20] sm:$0xff] %vm225_vm2, %v673_v2  ;;  %3366 = vmatmul.mubr.msk.f32.gmra.mxu1 %vm225_vm2, %v3918_v61 }
 0x153   : > { %3413 = vmatmul.mubr.msk.f32.gmra.mxu0 %vm225_vm2, %v3852_v30  ;;  %v675_v7 = vpop.permute.xlu1 %674  ;;  %3368 = vmatprep.mubr.msk.f32.mxu1 %vm225_vm2, %v3926_v0 }
 0x154   : > { %765 = vst.msk [vmem:[%s4016_s16 + $0x28] sm:$0xff] %vm225_vm2, %v675_v7  ;;  %3415 = vmatprep.mubr.msk.f32.mxu0 %vm225_vm2, %v3863_v39 }
 0x155   : > { %v677_v6 = vpop.permute.xlu0 %676 }
 0x156   : > { %766 = vst.msk [vmem:[%s4016_s16 + $0x30] sm:$0xff] %vm225_vm2, %v677_v6  ;;  %3369 = vmatmul.mubr.msk.f32.gmra.mxu1 %vm225_vm2, %v3928_v1 }
 0x157   : > { %3416 = vmatmul.mubr.msk.f32.gmra.mxu0 %vm225_vm2, %v3870_v45  ;;  %v679_v8 = vpop.permute.xlu1 %678  ;;  %3371 = vmatprep.mubr.msk.f32.mxu1 %vm225_vm2, %v4062_v10 }
 0x158   : > { %767 = vst.msk [vmem:[%s4016_s16 + $0x38] sm:$0xff] %vm225_vm2, %v679_v8  ;;  %3418 = vmatprep.mubr.msk.f32.mxu0 %vm225_vm2, %v3881_v52 }
 0x159   : > { %v681_v12 = vpop.permute.xlu0 %680 }
 0x15a   : > { %768 = vst.msk [vmem:[%s4016_s16 + $0x40] sm:$0xff] %vm225_vm2, %v681_v12  ;;  %3372 = vmatmul.mubr.msk.f32.gmra.mxu1 %vm225_vm2, %v4072_v11 }
 0x15b   : > { %3419 = vmatmul.mubr.msk.f32.gmra.mxu0 %vm225_vm2, %v3888_v56  ;;  %v683_v13 = vpop.permute.xlu1 %682  ;;  %3426 = vmatprep.mubr.msk.f32.mxu1 %vm225_vm2, %v3701_v15 }
 0x15c   : > { %769 = vst.msk [vmem:[%s4016_s16 + $0x48] sm:$0xff] %vm225_vm2, %v683_v13  ;;  %3421 = vmatprep.mubr.msk.f32.mxu0 %vm225_vm2, %v3898_v41 }
 0x15d   : > { %v685_v14 = vpop.permute.xlu0 %684 }
 0x15e   : > { %770 = vst.msk [vmem:[%s4016_s16 + $0x50] sm:$0xff] %vm225_vm2, %v685_v14  ;;  %3427 = vmatmul.mubr.msk.f32.vlgmr.msra.gmra.mxu1 %vm225_vm2, %v3708_v18 }
 0x15f   : > { %3422 = vmatmul.mubr.msk.f32.gmra.mxu0 %vm225_vm2, %v3905_v58  ;;  %v687_v17 = vpop.permute.xlu1 %686  ;;  %3429 = vmatprep.mubr.msk.f32.mxu1 %vm225_vm2, %v3719_v23 }
 0x160   : > { %771 = vst.msk [vmem:[%s4016_s16 + $0x58] sm:$0xff] %vm225_vm2, %v687_v17 }
 0x161   : > { %v689_v15 = vpop.permute.xlu0 %688 }
 0x162   : > { %772 = vst.msk [vmem:[%s4016_s16 + $0x60] sm:$0xff] %vm225_vm2, %v689_v15  ;;  %3430 = vmatmul.mubr.msk.f32.gmra.mxu1 %vm225_vm2, %v3726_v26 }
 0x163   : > { %v691_v19 = vpop.permute.xlu1 %690  ;;  %3432 = vmatprep.mubr.msk.f32.mxu1 %vm225_vm2, %v3737_v31 }
 0x164   : > { %773 = vst.msk [vmem:[%s4016_s16 + $0x68] sm:$0xff] %vm225_vm2, %v691_v19 }
 0x165   : > { %v693_v18 = vpop.permute.xlu0 %692 }
 0x166   : > { %774 = vst.msk [vmem:[%s4016_s16 + $0x70] sm:$0xff] %vm225_vm2, %v693_v18  ;;  %3433 = vmatmul.mubr.msk.f32.gmra.mxu1 %vm225_vm2, %v3744_v34 }
 0x167   : > { %v695_v23 = vpop.permute.xlu1 %694  ;;  %3435 = vmatprep.mubr.msk.f32.mxu1 %vm225_vm2, %v3755_v43 }
 0x168   : > { %775 = vst.msk [vmem:[%s4016_s16 + $0x78] sm:$0xff] %vm225_vm2, %v695_v23 }
 0x169   : > { %v697_v26 = vpop.permute.xlu0 %696 }
 0x16a   : > { %776 = vst.msk [vmem:[%s4016_s16 + $0x80] sm:$0xff] %vm225_vm2, %v697_v26  ;;  %3436 = vmatmul.mubr.msk.f32.gmra.mxu1 %vm225_vm2, %v3762_v46 }
 0x16b   : > { %v699_v31 = vpop.permute.xlu1 %698  ;;  %3438 = vmatprep.mubr.msk.f32.mxu1 %vm225_vm2, %v3773_v51 }
 0x16c   : > { %777 = vst.msk [vmem:[%s4016_s16 + $0x88] sm:$0xff] %vm225_vm2, %v699_v31 }
 0x16d   : > { %v701_v34 = vpop.permute.xlu0 %700 }
 0x16e   : > { %778 = vst.msk [vmem:[%s4016_s16 + $0x90] sm:$0xff] %vm225_vm2, %v701_v34  ;;  %3439 = vmatmul.mubr.msk.f32.gmra.mxu1 %vm225_vm2, %v3780_v54 }
 0x16f   : > { %v703_v43 = vpop.permute.xlu1 %702  ;;  %3441 = vmatprep.mubr.msk.f32.mxu1 %vm225_vm2, %v3791_v59 }
 0x170   : > { %779 = vst.msk [vmem:[%s4016_s16 + $0x98] sm:$0xff] %vm225_vm2, %v703_v43 }
 0x171   : > { %v705_v46 = vpop.permute.xlu0 %704 }
 0x172   : > { %780 = vst.msk [vmem:[%s4016_s16 + $0xa0] sm:$0xff] %vm225_vm2, %v705_v46  ;;  %3442 = vmatmul.mubr.msk.f32.gmra.mxu1 %vm225_vm2, %v3798_v62 }
 0x173   : > { %v707_v51 = vpop.permute.xlu1 %706  ;;  %3444 = vmatprep.mubr.msk.f32.mxu1 %vm225_vm2, %v3809_v5 }
 0x174   : > { %781 = vst.msk [vmem:[%s4016_s16 + $0xa8] sm:$0xff] %vm225_vm2, %v707_v51 }
 0x175   : > { %v709_v54 = vpop.permute.xlu0 %708 }
 0x176   : > { %782 = vst.msk [vmem:[%s4016_s16 + $0xb0] sm:$0xff] %vm225_vm2, %v709_v54  ;;  %3445 = vmatmul.mubr.msk.f32.gmra.mxu1 %vm225_vm2, %v3816_v9 }
 0x177   : > { %v711_v59 = vpop.permute.xlu1 %710  ;;  %3447 = vmatprep.mubr.msk.f32.mxu1 %vm225_vm2, %v3827_v16 }
 0x178   : > { %783 = vst.msk [vmem:[%s4016_s16 + $0xb8] sm:$0xff] %vm225_vm2, %v711_v59 }
 0x179   : > { %v713_v62 = vpop.permute.xlu0 %712 }
 0x17a   : > { %784 = vst.msk [vmem:[%s4016_s16 + $0xc0] sm:$0xff] %vm225_vm2, %v713_v62  ;;  %3448 = vmatmul.mubr.msk.f32.gmra.mxu1 %vm225_vm2, %v3834_v20 }
 0x17b   : > { %v715_v5 = vpop.permute.xlu1 %714  ;;  %3450 = vmatprep.mubr.msk.f32.mxu1 %vm225_vm2, %v3845_v27  ;;  %v2218_v27 = vld [vmem:[#allocation2 + $0x138] sm:$0xff] }
 0x17c   : > { %785 = vst.msk [vmem:[%s4016_s16 + $0xc8] sm:$0xff] %vm225_vm2, %v715_v5 }
 0x17d   : > { %v717_v9 = vpop.permute.xlu0 %716 }
 0x17e   : > { %786 = vst.msk [vmem:[%s4016_s16 + $0xd0] sm:$0xff] %vm225_vm2, %v717_v9  ;;  %3451 = vmatmul.mubr.msk.f32.gmra.mxu1 %vm225_vm2, %v3852_v30 }
 0x17f   : > { %v719_v16 = vpop.permute.xlu1 %718  ;;  %3453 = vmatprep.mubr.msk.f32.mxu1 %vm225_vm2, %v3863_v39 }
 0x180   : > { %787 = vst.msk [vmem:[%s4016_s16 + $0xd8] sm:$0xff] %vm225_vm2, %v719_v16 }
 0x181   : > { %v721_v20 = vpop.permute.xlu0 %720 }
 0x182   : > { %788 = vst.msk [vmem:[%s4016_s16 + $0xe0] sm:$0xff] %vm225_vm2, %v721_v20  ;;  %3454 = vmatmul.mubr.msk.f32.gmra.mxu1 %vm225_vm2, %v3870_v45 }
 0x183   : > { %v723_v21 = vpop.permute.xlu1 %722  ;;  %3456 = vmatprep.mubr.msk.f32.mxu1 %vm225_vm2, %v3881_v52 }
 0x184   : > { %789 = vst.msk [vmem:[%s4016_s16 + $0xe8] sm:$0xff] %vm225_vm2, %v723_v21 }
 0x185   : > { %v725_v22 = vpop.permute.xlu0 %724 }
 0x186   : > { %3457 = vmatmul.mubr.msk.f32.gmra.mxu1 %vm225_vm2, %v3888_v56  ;;  %790 = vst.msk [vmem:[%s4016_s16 + $0xf0] sm:$0xff] %vm225_vm2, %v725_v22 }
 0x187   : > { %3459 = vmatprep.mubr.msk.f32.mxu1 %vm225_vm2, %v3898_v41 }
 0x188   : > { %v727_v24 = vpop.permute.xlu1 %726 }
 0x189   : > { %791 = vst.msk [vmem:[%s4016_s16 + $0xf8] sm:$0xff] %vm225_vm2, %v727_v24 }
 0x18a   : > { %3460 = vmatmul.mubr.msk.f32.gmra.mxu1 %vm225_vm2, %v3905_v58 }
 0x18b   : > { %3462 = vmatprep.mubr.msk.f32.mxu1 %vm225_vm2, %v3912_v60 }
 0x18e   : > { %3463 = vmatmul.mubr.msk.f32.gmra.mxu1 %vm225_vm2, %v3918_v61 }
 0x18f   : > { %3465 = vmatprep.mubr.msk.f32.mxu1 %vm225_vm2, %v3926_v0 }
 0x192   : > { %3466 = vmatmul.mubr.msk.f32.gmra.mxu1 %vm225_vm2, %v3928_v1 }
 0x193   : > { %3468 = vmatprep.mubr.msk.f32.mxu1 %vm225_vm2, %v4062_v10 }
 0x196   : > { %3469 = vmatmul.mubr.msk.f32.gmra.mxu1 %vm225_vm2, %v4072_v11 }
 0x197   : > { %3471 = vmatprep.mubr.msk.f32.mxu1 %vm225_vm2, %v2217_v25 }
 0x19a   : > { %3472 = vmatmul.mubr.msk.f32.gmra.mxu1 %vm225_vm2, %v2218_v27 }
 0x1a2   : > { %v4200_v30 = vpop.f32.mrf.mxu1 }
 0x1a3   : > { %v4202_v32 = vpop.f32.mrf.mxu0 }
 0x1a4   : > { %v4204_v33 = vpop.f32.mrf.mxu1 }
 0x1a5   : > { %v4206_v37 = vpop.f32.mrf.mxu0 }
 0x1a6   : > { %v4208_v38 = vpop.f32.mrf.mxu1 }
 0x1a7   : > { %v4210_v39 = vpop.f32.mrf.mxu0 }
 0x1a8   : > { %v4212_v42 = vpop.f32.mrf.mxu1 }
 0x1a9   : > { %v4214_v44 = vpop.f32.mrf.mxu0 }
 0x1aa   : > { %v4216_v45 = vpop.f32.mrf.mxu1 }
 0x1ab   : > { %v4218_v47 = vpop.f32.mrf.mxu0 }
 0x1ac   : > { %v4220_v48 = vpop.f32.mrf.mxu1 }
 0x1ad   : > { %v4222_v49 = vpop.f32.mrf.mxu0 }
 0x1ae   : > { %v4224_v50 = vpop.f32.mrf.mxu1 }
 0x1af   : > { %v4226_v52 = vpop.f32.mrf.mxu0 }
 0x1b0   : > { %v4228_v53 = vpop.f32.mrf.mxu1 }
 0x1b1   : > { %v4230_v55 = vpop.f32.mrf.mxu0 }
 0x1b2   : > { %v4232_v56 = vpop.f32.mrf.mxu1 }
 0x1b3   : > { %v4234_v57 = vpop.f32.mrf.mxu0 }
 0x1b4   : > { %v4236_v41 = vpop.f32.mrf.mxu1 }
 0x1b5   : > { %v4238_v58 = vpop.f32.mrf.mxu0 }
 0x1b6   : > { %v4240_v60 = vpop.f32.mrf.mxu1 }
 0x1b7   : > { %v4242_v61 = vpop.f32.mrf.mxu0 }
 0x1b8   : > { %v4244_v0 = vpop.f32.mrf.mxu1 }
 0x1b9   : > { %v4246_v1 = vpop.f32.mrf.mxu0 }
 0x1ba   : > { %v4248_v3 = vpop.f32.mrf.mxu1 }
 0x1bb   : > { %4683 = vst [vmem:[#allocation3_spill] sm:$0xff] %v4248_v3  ;;  %v4250_v4 = vpop.f32.mrf.mxu0 }
 0x1bc   : > { %v4252_v35 = vpop.f32.mrf.mxu1 }
 0x1bd   : > { %4684 = vst [vmem:[#allocation4_spill] sm:$0xff] %v4252_v35  ;;  %v4254_v36 = vpop.f32.mrf.mxu0 }
 0x1be   : > { %v4256_v40 = vpop.f32.mrf.mxu1 }
 0x1bf   : > { %4685 = vst [vmem:[#allocation5_spill] sm:$0xff] %v4256_v40  ;;  %v4258_v63 = vpop.f32.mrf.mxu0 }
 0x1c0   : > { %4686 = vst [vmem:[#allocation6_spill] sm:$0xff] %v4258_v63  ;;  %v4260_v2 = vpop.f32.mrf.mxu1 }
 0x1c1   : > { %4687 = vst [vmem:[#allocation7_spill] sm:$0xff] %v4260_v2  ;;  %v4262_v7 = vpop.f32.mrf.mxu0 }
 0x1c2   : > { %4688 = vst [vmem:[#allocation8_spill] sm:$0xff] %v4262_v7  ;;  %v4264_v10 = vpop.f32.mrf.mxu1 }
 0x1c3   : > { %4689 = vst [vmem:[#allocation9_spill] sm:$0xff] %v4264_v10  ;;  %v4266_v6 = vpop.f32.mrf.mxu0 }
 0x1c4   : > { %4690 = vst [vmem:[#allocation10_spill] sm:$0xff] %v4266_v6  ;;  %v4268_v8 = vpop.f32.mrf.mxu1 }
 0x1c5   : > { %4691 = vst [vmem:[#allocation11_spill] sm:$0xff] %v4268_v8  ;;  %v4270_v11 = vpop.f32.mrf.mxu0 }
 0x1c6   : > { %4692 = vst [vmem:[#allocation12_spill] sm:$0xff] %v4270_v11  ;;  %v4272_v12 = vpop.f32.mrf.mxu1 }
 0x1c7   : > { %4693 = vst [vmem:[#allocation13_spill] sm:$0xff] %v4272_v12  ;;  %v4274_v13 = vpop.f32.mrf.mxu0 }
 0x1c8   : > { %4694 = vst [vmem:[#allocation14_spill] sm:$0xff] %v4274_v13  ;;  %v4276_v14 = vpop.f32.mrf.mxu1 }
 0x1c9   : > { %4695 = vst [vmem:[#allocation15_spill] sm:$0xff] %v4276_v14  ;;  %v4278_v17 = vpop.f32.mrf.mxu0 }
 0x1ca   : > { %4696 = vst [vmem:[#allocation16_spill] sm:$0xff] %v4278_v17  ;;  %v4280_v15 = vpop.f32.mrf.mxu1 }
 0x1cb   : > { %4697 = vst [vmem:[#allocation17_spill] sm:$0xff] %v4280_v15  ;;  %v4282_v19 = vpop.f32.mrf.mxu0 }
 0x1cc   : > { %4698 = vst [vmem:[#allocation18_spill] sm:$0xff] %v4282_v19  ;;  %v4284_v18 = vpop.f32.mrf.mxu1 }
 0x1cd   : > { %4699 = vst [vmem:[#allocation19_spill] sm:$0xff] %v4284_v18  ;;  %v4286_v23 = vpop.f32.mrf.mxu0 }
 0x1ce   : > { %4700 = vst [vmem:[#allocation20_spill] sm:$0xff] %v4286_v23  ;;  %v4288_v26 = vpop.f32.mrf.mxu1 }
 0x1cf   : > { %4701 = vst [vmem:[#allocation21_spill] sm:$0xff] %v4288_v26  ;;  %v4290_v31 = vpop.f32.mrf.mxu0 }
 0x1d0   : > { %4702 = vst [vmem:[#allocation22_spill] sm:$0xff] %v4290_v31  ;;  %v4292_v34 = vpop.f32.mrf.mxu1 }
 0x1d1   : > { %4703 = vst [vmem:[#allocation23_spill] sm:$0xff] %v4292_v34  ;;  %v4294_v43 = vpop.f32.mrf.mxu0 }
 0x1d2   : > { %4704 = vst [vmem:[#allocation24_spill] sm:$0xff] %v4294_v43  ;;  %v4296_v46 = vpop.f32.mrf.mxu1 }
 0x1d3   : > { %4705 = vst [vmem:[#allocation25_spill] sm:$0xff] %v4296_v46  ;;  %v4298_v51 = vpop.f32.mrf.mxu0 }
 0x1d4   : > { %4706 = vst [vmem:[#allocation26_spill] sm:$0xff] %v4298_v51  ;;  %v4300_v54 = vpop.f32.mrf.mxu1 }
 0x1d5   : > { %4707 = vst [vmem:[#allocation27_spill] sm:$0xff] %v4300_v54  ;;  %v4302_v59 = vpop.f32.mrf.mxu0 }
 0x1d6   : > { %4708 = vst [vmem:[#allocation28_spill] sm:$0xff] %v4302_v59  ;;  %v4304_v62 = vpop.f32.mrf.mxu1 }
 0x1d7   : > { %4709 = vst [vmem:[#allocation29_spill] sm:$0xff] %v4304_v62  ;;  %v4306_v5 = vpop.f32.mrf.mxu0 }
 0x1d8   : > { %4710 = vst [vmem:[#allocation30_spill] sm:$0xff] %v4306_v5  ;;  %v4308_v9 = vpop.f32.mrf.mxu1 }
 0x1d9   : > { %4711 = vst [vmem:[#allocation31_spill] sm:$0xff] %v4308_v9  ;;  %v4310_v16 = vpop.f32.mrf.mxu0 }
 0x1da   : > { %4712 = vst [vmem:[#allocation32_spill] sm:$0xff] %v4310_v16  ;;  %v4312_v20 = vpop.f32.mrf.mxu1 }
 0x1db   : > { %4713 = vst [vmem:[#allocation33_spill] sm:$0xff] %v4312_v20  ;;  %v4314_v21 = vpop.f32.mrf.mxu0 }
 0x1dc   : > { %4714 = vst [vmem:[#allocation34_spill] sm:$0xff] %v4314_v21  ;;  %v4316_v22 = vpop.f32.mrf.mxu1 }
 0x1dd   : > { %4715 = vst [vmem:[#allocation35_spill] sm:$0xff] %v4316_v22  ;;  %v4318_v24 = vpop.f32.mrf.mxu0 }
 0x1de   : > { %4716 = vst [vmem:[#allocation36_spill] sm:$0xff] %v4318_v24  ;;  %v3328_v25 = vpop.f32.mrf.mxu1 }
 0x1df   : > { %v4320_v27 = vpop.f32.mrf.mxu0 }
 0x1e0   : > { %4717 = vst [vmem:[#allocation37_spill] sm:$0xff] %v4320_v27  ;;  %v1609_v54 = vpop.f32.mrf.mxu1 }
 0x1e1   : > { %v4322_v46 = vpop.f32.mrf.mxu0 }
 0x1e2   : > { %4718 = vst [vmem:[#allocation38_spill] sm:$0xff] %v4322_v46  ;;  %v3331_v62 = vpop.f32.mrf.mxu1 }
 0x1e3   : > { %v3378_v5 = vpop.f32.mrf.mxu0 }
 0x1e4   : > { %v1619_v59 = vpop.f32.mrf.mxu1 }
 0x1e5   : > { %v1996_v9 = vpop.f32.mrf.mxu0 }
 0x1e6   : > { %v4324_v34 = vpop.f32.mrf.mxu1 }
 0x1e7   : > { %v3381_v16 = vpop.f32.mrf.mxu0 }
 0x1e8   : > { %v4326_v20 = vpop.f32.mrf.mxu1 }
 0x1e9   : > { %v4328_v21 = vpop.f32.mrf.mxu0 }
 0x1ea   : > { %v4330_v22 = vpop.f32.mrf.mxu1 }
 0x1eb   : > { %v4332_v24 = vpop.f32.mrf.mxu0 }
 0x1ec   : > { %v4334_v51 = vpop.f32.mrf.mxu1 }
 0x1ed   : > { %v4338_v46 = vpop.f32.mrf.mxu0 }
 0x1ee   : > { %v4336_v27 = vpop.f32.mrf.mxu1 }
 0x1ef   : > { %v4344_v18 = vpop.f32.mrf.mxu0 }
 0x1f0   : > { %v4340_v26 = vpop.f32.mrf.mxu1 }
 0x1f1   : > { %v4350_v23 = vpop.f32.mrf.mxu0 }
 0x1f2   : > { %v4342_v43 = vpop.f32.mrf.mxu1 }
 0x1f3   : > { %v4356_v12 = vpop.f32.mrf.mxu0 }
 0x1f4   : > { %v4346_v31 = vpop.f32.mrf.mxu1 }
 0x1f5   : > { %v4362_v13 = vpop.f32.mrf.mxu0 }
 0x1f6   : > { %v4348_v15 = vpop.f32.mrf.mxu1 }
 0x1f7   : > { %v4368_v2 = vpop.f32.mrf.mxu0 }
 0x1f8   : > { %v4352_v14 = vpop.f32.mrf.mxu1 }
 0x1f9   : > { %4719 = vst [vmem:[#allocation39_spill] sm:$0xff] %v4352_v14  ;;  %v4374_v7 = vpop.f32.mrf.mxu0 }
 0x1fa   : > { %v4354_v19 = vpop.f32.mrf.mxu1 }
 0x1fb   : > { %4720 = vst [vmem:[#allocation40_spill] sm:$0xff] %v4354_v19 }
 0x1fc   : > { %v4358_v17 = vpop.f32.mrf.mxu1 }
 0x1fd   : > { %4721 = vst [vmem:[#allocation41_spill] sm:$0xff] %v4358_v17  ;;  %v4380_v17 = vpop.f32.mrf.mxu0 }
 0x1fe   : > { %v4360_v8 = vpop.f32.mrf.mxu1 }
 0x1ff   : > { %4722 = vst [vmem:[#allocation42_spill] sm:$0xff] %v4360_v8 }
 0x200   : > { %v4364_v10 = vpop.f32.mrf.mxu1 }
 0x201   : > { %4723 = vst [vmem:[#allocation43_spill] sm:$0xff] %v4364_v10  ;;  %v4386_v10 = vpop.f32.mrf.mxu0 }
 0x202   : > { %v4366_v11 = vpop.f32.mrf.mxu1  ;;  %4731 = vst [vmem:[#allocation51_spill] sm:$0xff] %v4386_v10 }
 0x203   : > { %4724 = vst [vmem:[#allocation44_spill] sm:$0xff] %v4366_v11 }
 0x204   : > { %v4370_v6 = vpop.f32.mrf.mxu1 }
 0x205   : > { %4725 = vst [vmem:[#allocation45_spill] sm:$0xff] %v4370_v6  ;;  %v4392_v6 = vpop.f32.mrf.mxu0 }
 0x206   : > { %v4372_v40 = vpop.f32.mrf.mxu1  ;;  %4734 = vst [vmem:[#allocation54_spill] sm:$0xff] %v4392_v6 }
 0x207   : > { %4726 = vst [vmem:[#allocation46_spill] sm:$0xff] %v4372_v40 }
 0x208   : > { %v4376_v19 = vpop.f32.mrf.mxu1 }
 0x209   : > { %4727 = vst [vmem:[#allocation47_spill] sm:$0xff] %v4376_v19  ;;  %v4398_v19 = vpop.f32.mrf.mxu0 }
 0x20a   : > { %v4378_v35 = vpop.f32.mrf.mxu1  ;;  %4737 = vst [vmem:[#allocation57_spill] sm:$0xff] %v4398_v19 }
 0x20b   : > { %4728 = vst [vmem:[#allocation48_spill] sm:$0xff] %v4378_v35 }
 0x20c   : > { %v4382_v8 = vpop.f32.mrf.mxu1 }
 0x20d   : > { %4729 = vst [vmem:[#allocation49_spill] sm:$0xff] %v4382_v8  ;;  %v1260_v8 = vadd.f32 %v4202_v32, %v4196_v28  ;;  %v4417_v28 = vld [vmem:[%s4681_s4] ss:$0 sm:$0xff] }
 0x20e   : > { %v4384_v14 = vpop.f32.mrf.mxu1 }
 0x20f   : > { %4730 = vst [vmem:[#allocation50_spill] sm:$0xff] %v4384_v14  ;;  %v1769_v10 = vadd.f32 %v3328_v25, %v1260_v8  ;;  %v1280_v25 = vadd.f32 %v4218_v47, %v4208_v38 }
 0x210   : > { %v4388_v11 = vpop.f32.mrf.mxu1 }
 0x211   : > { %4732 = vst [vmem:[#allocation52_spill] sm:$0xff] %v4388_v11  ;;  %v1255_v11 = vadd.f32 %v4206_v37, %v4198_v29  ;;  %v2156_v19 = vadd.f32 %v3378_v5, %v1769_v10  ;;  %v1265_v29 = vadd.f32 %v4214_v44, %v4204_v33  ;;  %v1275_v5 = vadd.f32 %v4222_v49, %v4212_v42  ;;  %v2614_v44 = vld [vmem:[%s4016_s16 + $0x8] sm:$0xff]  ;;  %v2613_v42 = vld [vmem:[%s4016_s16] sm:$0xff] }
 0x212   : > { %v4390_v63 = vpop.f32.mrf.mxu1  ;;  %v1773_v33 = vadd.f32 %v4324_v34, %v1280_v25  ;;  %v1300_v25 = vadd.f32 %v4234_v57, %v4224_v50  ;;  %v2618_v57 = vld [vmem:[%s4016_s16 + $0x28] sm:$0xff] }
 0x213   : > { %4733 = vst [vmem:[#allocation53_spill] sm:$0xff] %v4390_v63  ;;  %v4408_v63 = vpop.f32.mrf.mxu0 }
 0x214   : > { %v4394_v40 = vpop.f32.mrf.mxu1  ;;  %v2160_v34 = vadd.f32 %v4332_v24, %v1773_v33  ;;  %v1777_v50 = vadd.f32 %v4336_v27, %v1300_v25  ;;  %v4742_v25 = vld [vmem:[#allocation39_spill] sm:$0xff] }
 0x215   : > { %4735 = vst [vmem:[#allocation55_spill] sm:$0xff] %v4394_v40  ;;  %v1768_v40 = vadd.f32 %v1609_v54, %v1255_v11 }
 0x216   : > { %v4396_v3 = vpop.f32.mrf.mxu1 }
 0x217   : > { %4736 = vst [vmem:[#allocation56_spill] sm:$0xff] %v4396_v3  ;;  %v1270_v3 = vadd.f32 %v4210_v39, %v4200_v30  ;;  %v2155_v37 = vadd.f32 %v1996_v9, %v1768_v40  ;;  %v1770_v39 = vadd.f32 %v1619_v59, %v1265_v29  ;;  %v1772_v59 = vadd.f32 %v4326_v20, %v1275_v5 }
 0x218   : > { %v4400_v35 = vpop.f32.mrf.mxu1  ;;  %v1285_v29 = vadd.f32 %v4230_v55, %v4220_v48  ;;  %v2615_v55 = vld [vmem:[%s4016_s16 + $0x10] sm:$0xff] }
 0x219   : > { %4738 = vst [vmem:[#allocation58_spill] sm:$0xff] %v4400_v35  ;;  %v1771_v32 = vadd.f32 %v3331_v62, %v1270_v3 }
 0x21a   : > { %v4404_v14 = vpop.f32.mrf.mxu1 }
 0x21b   : > { %v2158_v10 = vadd.f32 %v3381_v16, %v1771_v32  ;;  %v2159_v32 = vadd.f32 %v4338_v46, %v1772_v59 }
 0x21c   : > { %v4410_v6 = vpop.f32.mrf.mxu1 }
 0x21d   : > { %4739 = vst [vmem:[#allocation59_spill] sm:$0xff] %v4410_v6  ;;  %v4423_v6 = vpop.f32.mrf.mxu0 }
 0x21e   : > { %v3428_v35 = vpop.f32.mrf.mxu1 }
 0x21f   : > { %v2543_v8 = vadd.f32 %v3428_v35, %v2156_v19  ;;  %v2157_v35 = vadd.f32 %v4328_v21, %v1770_v39  ;;  %v1290_v19 = vadd.f32 %v4226_v52, %v4216_v45  ;;  %v4435_v62 = vpop.f32.mrf.mxu0  ;;  %v2616_v52 = vld [vmem:[%s4016_s16 + $0x18] sm:$0xff] }
 0x220   : > { %v2383_v30 = vpop.f32.mrf.mxu1 }
 0x221   : > { %v2582_v11 = vadd.f32 %v4417_v28, %v2543_v8  ;;  %v2542_v54 = vadd.f32 %v2383_v30, %v2155_v37  ;;  %v1775_v45 = vadd.f32 %v4330_v22, %v1290_v19  ;;  %v1774_v30 = vadd.f32 %v4334_v51, %v1285_v29  ;;  %v4453_v48 = vpop.f32.mrf.mxu0 }
 0x222   : > { %v3431_v3 = vpop.f32.mrf.mxu1  ;;  %v1305_v19 = vadd.f32 %v4246_v1, %v4236_v41  ;;  %v2619_v1 = vld [vmem:[%s4016_s16 + $0x30] sm:$0xff] }
 0x223   : > { %v2646_v38 = vadd.f32 %v2614_v44, %v2582_v11  ;;  %v2581_v47 = vadd.f32 %v4417_v28, %v2542_v54  ;;  %v2545_v40 = vadd.f32 %v3431_v3, %v2158_v10  ;;  %v2162_v39 = vadd.f32 %v4344_v18, %v1775_v45 }
 0x224   : > { %v2393_v49 = vpop.f32.mrf.mxu1  ;;  %v1295_v54 = vadd.f32 %v4238_v58, %v4228_v53  ;;  %v2161_v5 = vadd.f32 %v4350_v23, %v1774_v30  ;;  %v1310_v3 = vadd.f32 %v4242_v61, %v4232_v56  ;;  %v4471_v53 = vpop.f32.mrf.mxu0  ;;  %v2617_v58 = vld [vmem:[%s4016_s16 + $0x20] sm:$0xff]  ;;  %v2620_v61 = vld [vmem:[%s4016_s16 + $0x38] sm:$0xff]  ;;  %v1315_v45 = vadd.f32 %v4254_v36, %v4244_v0 }
 0x225   : > { %2678 = vst.msk [vmem:[%s4016_s16 + $0x8] sm:$0xff] %vm225_vm2, %v2646_v38  ;;  %v2645_v9 = vadd.f32 %v2613_v42, %v2581_v47  ;;  %v2584_v16 = vadd.f32 %v4417_v28, %v2545_v40  ;;  %v2544_v21 = vadd.f32 %v2393_v49, %v2157_v35  ;;  %v2164_v38 = vadd.f32 %v4356_v12, %v1777_v50  ;;  %v2621_v36 = vld [vmem:[%s4016_s16 + $0x40] sm:$0xff] }
 0x226   : > { %v3434_v20 = vpop.f32.mrf.mxu1  ;;  %v1776_v35 = vadd.f32 %v4340_v26, %v1295_v54  ;;  %v1779_v56 = vadd.f32 %v4342_v43, %v1310_v3  ;;  %v4489_v41 = vpop.f32.mrf.mxu0  ;;  %v1780_v30 = vadd.f32 %v4742_v25, %v1315_v45  ;;  %v4745_v54 = vld [vmem:[#allocation40_spill] sm:$0xff]  ;;  %v4747_v3 = vld [vmem:[#allocation5_spill] sm:$0xff] }
 0x227   : > { %2677 = vst.msk [vmem:[%s4016_s16] sm:$0xff] %vm225_vm2, %v2645_v9  ;;  %v2648_v24 = vadd.f32 %v2616_v52, %v2584_v16  ;;  %v2583_v37 = vadd.f32 %v4417_v28, %v2544_v21  ;;  %v2547_v8 = vadd.f32 %v3434_v20, %v2160_v34  ;;  %v1320_v34 = vadd.f32 %v4250_v4, %v4240_v60  ;;  %v2622_v4 = vld [vmem:[%s4016_s16 + $0x48] sm:$0xff] }
 0x228   : > { %v2403_v22 = vpop.f32.mrf.mxu1  ;;  %v2163_v59 = vadd.f32 %v4362_v13, %v1776_v35  ;;  %v1778_v9 = vadd.f32 %v4346_v31, %v1305_v19  ;;  %v2166_v16 = vadd.f32 %v4368_v2, %v1779_v56  ;;  %v4507_v0 = vpop.f32.mrf.mxu0  ;;  %v4748_v35 = vld [vmem:[#allocation10_spill] sm:$0xff] }
 0x229   : > { %2680 = vst.msk [vmem:[%s4016_s16 + $0x18] sm:$0xff] %vm225_vm2, %v2648_v24  ;;  %v2647_v46 = vadd.f32 %v2615_v55, %v2583_v37  ;;  %v2586_v10 = vadd.f32 %v4417_v28, %v2547_v8  ;;  %v2546_v11 = vadd.f32 %v2403_v22, %v2159_v32  ;;  %v1781_v60 = vadd.f32 %v4348_v15, %v1320_v34  ;;  %v4740_v24 = vld [vmem:[#allocation3_spill] sm:$0xff]  ;;  %v4741_v37 = vld [vmem:[#allocation6_spill] sm:$0xff] }
 0x22a   : > { %v3437_v51 = vpop.f32.mrf.mxu1  ;;  %v2165_v52 = vadd.f32 %v4374_v7, %v1778_v9  ;;  %v1330_v8 = vadd.f32 %v4741_v37, %v4740_v24  ;;  %v4750_v19 = vld [vmem:[#allocation54_spill] sm:$0xff] }
 0x22b   : > { %2679 = vst.msk [vmem:[%s4016_s16 + $0x10] sm:$0xff] %vm225_vm2, %v2647_v46  ;;  %v2650_v18 = vadd.f32 %v2618_v57, %v2586_v10  ;;  %v2585_v33 = vadd.f32 %v4417_v28, %v2546_v11  ;;  %v2549_v44 = vadd.f32 %v3437_v51, %v2162_v39  ;;  %v2168_v55 = vadd.f32 %v4380_v17, %v1781_v60  ;;  %v4743_v46 = vld [vmem:[#allocation4_spill] sm:$0xff]  ;;  %v2624_v57 = vld [vmem:[%s4016_s16 + $0x58] sm:$0xff]  ;;  %v4755_v60 = vld [vmem:[#allocation9_spill] sm:$0xff] }
 0x22c   : > { %v2413_v27 = vpop.f32.mrf.mxu1  ;;  %v4744_v10 = vld [vmem:[#allocation8_spill] sm:$0xff]  ;;  %v1783_v50 = vadd.f32 %v4745_v54, %v1330_v8  ;;  %v4753_v34 = vld [vmem:[#allocation42_spill] sm:$0xff] }
 0x22d   : > { %2682 = vst.msk [vmem:[%s4016_s16 + $0x28] sm:$0xff] %vm225_vm2, %v2650_v18  ;;  %v2649_v23 = vadd.f32 %v2617_v58, %v2585_v33  ;;  %v2588_v47 = vadd.f32 %v4417_v28, %v2549_v44  ;;  %v2548_v40 = vadd.f32 %v2413_v27, %v2161_v5  ;;  %v1325_v11 = vadd.f32 %v4744_v10, %v4743_v46  ;;  %v4746_v5 = vld [vmem:[#allocation51_spill] sm:$0xff]  ;;  %v4749_v27 = vld [vmem:[#allocation41_spill] sm:$0xff] }
 0x22e   : > { %v3440_v26 = vpop.f32.mrf.mxu1  ;;  %v2167_v18 = vadd.f32 %v4746_v5, %v1780_v30  ;;  %v1340_v58 = vadd.f32 %v4748_v35, %v4747_v3  ;;  %v2170_v56 = vadd.f32 %v4750_v19, %v1783_v50  ;;  %v4761_v50 = vld [vmem:[#allocation13_spill] sm:$0xff] }
 0x22f   : > { %2681 = vst.msk [vmem:[%s4016_s16 + $0x20] sm:$0xff] %vm225_vm2, %v2649_v23  ;;  %v2652_v12 = vadd.f32 %v2620_v61, %v2588_v47  ;;  %v2587_v42 = vadd.f32 %v4417_v28, %v2548_v40  ;;  %v2551_v49 = vadd.f32 %v3440_v26, %v2164_v38  ;;  %v1782_v38 = vadd.f32 %v4749_v27, %v1325_v11  ;;  %v4525_v23 = vpop.f32.mrf.mxu0  ;;  %v2623_v47 = vld [vmem:[%s4016_s16 + $0x50] sm:$0xff]  ;;  %v4764_v27 = vld [vmem:[#allocation15_spill] sm:$0xff] }
 0x230   : > { %v2423_v43 = vpop.f32.mrf.mxu1  ;;  %v1785_v9 = vadd.f32 %v4753_v34, %v1340_v58  ;;  %v4763_v5 = vld [vmem:[#allocation45_spill] sm:$0xff] }
 0x231   : > { %2684 = vst.msk [vmem:[%s4016_s16 + $0x38] sm:$0xff] %vm225_vm2, %v2652_v12  ;;  %v2651_v13 = vadd.f32 %v2619_v1, %v2587_v42  ;;  %v2590_v21 = vadd.f32 %v4417_v28, %v2551_v49  ;;  %v2550_v29 = vadd.f32 %v2423_v43, %v2163_v59  ;;  %v4751_v12 = vld [vmem:[#allocation7_spill] sm:$0xff]  ;;  %v4752_v42 = vld [vmem:[#allocation12_spill] sm:$0xff] }
 0x232   : > { %v3443_v31 = vpop.f32.mrf.mxu1  ;;  %v1335_v49 = vadd.f32 %v4752_v42, %v4751_v12  ;;  %v2626_v1 = vld [vmem:[%s4016_s16 + $0x68] sm:$0xff]  ;;  %v2172_v37 = vadd.f32 %v4408_v63, %v1785_v9  ;;  %v4767_v42 = vld [vmem:[#allocation17_spill] sm:$0xff]  ;;  %v4769_v9 = vld [vmem:[#allocation47_spill] sm:$0xff] }
 0x233   : > { %2683 = vst.msk [vmem:[%s4016_s16 + $0x30] sm:$0xff] %vm225_vm2, %v2651_v13  ;;  %v2654_v2 = vadd.f32 %v2622_v4, %v2590_v21  ;;  %v2589_v20 = vadd.f32 %v4417_v28, %v2550_v29  ;;  %v2553_v32 = vadd.f32 %v3443_v31, %v2166_v16  ;;  %v4754_v16 = vld [vmem:[#allocation57_spill] sm:$0xff]  ;;  %v4756_v4 = vld [vmem:[#allocation14_spill] sm:$0xff] }
 0x234   : > { %v2433_v15 = vpop.f32.mrf.mxu1  ;;  %v2169_v13 = vadd.f32 %v4754_v16, %v1782_v38  ;;  %v1350_v31 = vadd.f32 %v4756_v4, %v4755_v60  ;;  %v4765_v38 = vld [vmem:[#allocation20_spill] sm:$0xff]  ;;  %v2629_v16 = vld [vmem:[%s4016_s16 + $0x80] sm:$0xff] }
 0x235   : > { %2686 = vst.msk [vmem:[%s4016_s16 + $0x48] sm:$0xff] %vm225_vm2, %v2654_v2  ;;  %v2653_v7 = vadd.f32 %v2621_v36, %v2589_v20  ;;  %v2592_v22 = vadd.f32 %v4417_v28, %v2553_v32  ;;  %v2552_v39 = vadd.f32 %v2433_v15, %v2165_v52  ;;  %v4757_v52 = vld [vmem:[#allocation43_spill] sm:$0xff]  ;;  %v4543_v20 = vpop.f32.mrf.mxu0  ;;  %v4759_v15 = vld [vmem:[#allocation16_spill] sm:$0xff] }
 0x236   : > { %v3446_v51 = vpop.f32.mrf.mxu1  ;;  %v1784_v2 = vadd.f32 %v4757_v52, %v1335_v49  ;;  %v2625_v32 = vld [vmem:[%s4016_s16 + $0x60] sm:$0xff]  ;;  %v4768_v49 = vld [vmem:[#allocation22_spill] sm:$0xff]  ;;  %v4771_v4 = vld [vmem:[#allocation24_spill] sm:$0xff] }
 0x237   : > { %2685 = vst.msk [vmem:[%s4016_s16 + $0x40] sm:$0xff] %vm225_vm2, %v2653_v7  ;;  %v2656_v17 = vadd.f32 %v2624_v57, %v2592_v22  ;;  %v2591_v33 = vadd.f32 %v4417_v28, %v2552_v39  ;;  %v2555_v44 = vadd.f32 %v3446_v51, %v2168_v55  ;;  %v4758_v36 = vld [vmem:[#allocation11_spill] sm:$0xff]  ;;  %v4760_v7 = vld [vmem:[#allocation44_spill] sm:$0xff]  ;;  %v2628_v39 = vld [vmem:[%s4016_s16 + $0x78] sm:$0xff]  ;;  %v1370_v34 = vadd.f32 %v4768_v49, %v4767_v42 }
 0x238   : > { %v2443_v40 = vpop.f32.mrf.mxu1  ;;  %v1345_v55 = vadd.f32 %v4759_v15, %v4758_v36  ;;  %v1787_v22 = vadd.f32 %v4760_v7, %v1350_v31  ;;  %v2171_v10 = vadd.f32 %v4423_v6, %v1784_v2  ;;  %v4762_v57 = vld [vmem:[#allocation18_spill] sm:$0xff]  ;;  %v4770_v60 = vld [vmem:[#allocation19_spill] sm:$0xff]  ;;  %v4772_v52 = vld [vmem:[#allocation48_spill] sm:$0xff] }
 0x239   : > { %2688 = vst.msk [vmem:[%s4016_s16 + $0x58] sm:$0xff] %vm225_vm2, %v2656_v17  ;;  %v2655_v61 = vadd.f32 %v2623_v47, %v2591_v33  ;;  %v2594_v26 = vadd.f32 %v4417_v28, %v2555_v44  ;;  %v2554_v59 = vadd.f32 %v2443_v40, %v2167_v18  ;;  %v1360_v51 = vadd.f32 %v4762_v57, %v4761_v50  ;;  %v4561_v17 = vpop.f32.mrf.mxu0  ;;  %v2627_v33 = vld [vmem:[%s4016_s16 + $0x70] sm:$0xff]  ;;  %v4766_v40 = vld [vmem:[#allocation46_spill] sm:$0xff]  ;;  %v4777_v50 = vld [vmem:[#allocation28_spill] sm:$0xff] }
 0x23a   : > { %v3449_v43 = vpop.f32.mrf.mxu1  ;;  %v1786_v18 = vadd.f32 %v4763_v5, %v1345_v55  ;;  %v2174_v3 = vadd.f32 %v4435_v62, %v1787_v22  ;;  %v1355_v47 = vadd.f32 %v4765_v38, %v4764_v27  ;;  %v1365_v31 = vadd.f32 %v4771_v4, %v4770_v60  ;;  %v4774_v36 = vld [vmem:[#allocation26_spill] sm:$0xff]  ;;  %v4775_v55 = vld [vmem:[#allocation49_spill] sm:$0xff]  ;;  %v4781_v38 = vld [vmem:[#allocation52_spill] sm:$0xff] }
 0x23b   : > { %2687 = vst.msk [vmem:[%s4016_s16 + $0x50] sm:$0xff] %vm225_vm2, %v2655_v61  ;;  %v2658_v21 = vadd.f32 %v2626_v1, %v2594_v26  ;;  %v2593_v29 = vadd.f32 %v4417_v28, %v2554_v59  ;;  %v2557_v45 = vadd.f32 %v3449_v43, %v2170_v56  ;;  %v1789_v19 = vadd.f32 %v4766_v40, %v1360_v51  ;;  %v2630_v56 = vld [vmem:[%s4016_s16 + $0x88] sm:$0xff]  ;;  %v3417_v43 = vpop.f32.mrf.mxu0  ;;  %v4778_v51 = vld [vmem:[#allocation50_spill] sm:$0xff]  ;;  %v4784_v49 = vld [vmem:[#allocation53_spill] sm:$0xff] }
 0x23c   : > { %v2453_v24 = vpop.f32.mrf.mxu1  ;;  %v2173_v26 = vadd.f32 %v4453_v48, %v1786_v18  ;;  %v1788_v1 = vadd.f32 %v4769_v9, %v1355_v47  ;;  %v1791_v2 = vadd.f32 %v4772_v52, %v1370_v34  ;;  %v1790_v7 = vadd.f32 %v4775_v55, %v1365_v31  ;;  %v2634_v18 = vld [vmem:[%s4016_s16 + $0xa8] sm:$0xff]  ;;  %v2636_v9 = vld [vmem:[%s4016_s16 + $0xb8] sm:$0xff]  ;;  %v4787_v60 = vld [vmem:[#allocation55_spill] sm:$0xff] }
 0x23d   : > { %2690 = vst.msk [vmem:[%s4016_s16 + $0x68] sm:$0xff] %vm225_vm2, %v2658_v21  ;;  %v2657_v8 = vadd.f32 %v2625_v32, %v2593_v29  ;;  %v2596_v25 = vadd.f32 %v4417_v28, %v2557_v45  ;;  %v2556_v30 = vadd.f32 %v2453_v24, %v2169_v13  ;;  %v2176_v21 = vadd.f32 %v4471_v53, %v1789_v19  ;;  %v2632_v32 = vld [vmem:[%s4016_s16 + $0x98] sm:$0xff]  ;;  %v2126_v22 = vpop.f32.mrf.mxu0  ;;  %v2633_v19 = vld [vmem:[%s4016_s16 + $0xa0] sm:$0xff]  ;;  %v2635_v52 = vld [vmem:[%s4016_s16 + $0xb0] sm:$0xff] }
 0x23e   : > { %v3452_v46 = vpop.f32.mrf.mxu1 }
 0x23f   : > { %2689 = vst.msk [vmem:[%s4016_s16 + $0x60] sm:$0xff] %vm225_vm2, %v2657_v8  ;;  %v2660_v63 = vadd.f32 %v2628_v39, %v2596_v25  ;;  %v2595_v11 = vadd.f32 %v4417_v28, %v2556_v30  ;;  %v2559_v54 = vadd.f32 %v3452_v46, %v2172_v37  ;;  %v2175_v37 = vadd.f32 %v4489_v41, %v1788_v1  ;;  %v4773_v30 = vld [vmem:[#allocation21_spill] sm:$0xff]  ;;  %v3420_v40 = vpop.f32.mrf.mxu0 }
 0x240   : > { %v2463_v44 = vpop.f32.mrf.mxu1  ;;  %v1380_v15 = vadd.f32 %v4774_v36, %v4773_v30  ;;  %v2631_v39 = vld [vmem:[%s4016_s16 + $0x90] sm:$0xff]  ;;  %v4790_v30 = vld [vmem:[#allocation56_spill] sm:$0xff] }
 0x241   : > { %2692 = vst.msk [vmem:[%s4016_s16 + $0x78] sm:$0xff] %vm225_vm2, %v2660_v63  ;;  %v2659_v6 = vadd.f32 %v2627_v33, %v2595_v11  ;;  %v2598_v35 = vadd.f32 %v4417_v28, %v2559_v54  ;;  %v2558_v58 = vadd.f32 %v2463_v44, %v2171_v10  ;;  %v2178_v10 = vadd.f32 %v4507_v0, %v1791_v2  ;;  %v4776_v54 = vld [vmem:[#allocation23_spill] sm:$0xff]  ;;  %v2136_v31 = vpop.f32.mrf.mxu0 }
 0x242   : > { %v3455_v61 = vpop.f32.mrf.mxu1  ;;  %v1375_v57 = vadd.f32 %v4777_v50, %v4776_v54  ;;  %v1793_v5 = vadd.f32 %v4778_v51, %v1380_v15  ;;  %v2177_v44 = vadd.f32 %v4525_v23, %v1790_v7  ;;  %v2638_v15 = vld [vmem:[%s4016_s16 + $0xc8] sm:$0xff] }
 0x243   : > { %2691 = vst.msk [vmem:[%s4016_s16 + $0x70] sm:$0xff] %vm225_vm2, %v2659_v6  ;;  %v2662_v62 = vadd.f32 %v2630_v56, %v2598_v35  ;;  %v2597_v59 = vadd.f32 %v4417_v28, %v2558_v58  ;;  %v2561_v12 = vadd.f32 %v3455_v61, %v2174_v3  ;;  %v4779_v35 = vld [vmem:[#allocation25_spill] sm:$0xff]  ;;  %v4780_v58 = vld [vmem:[#allocation30_spill] sm:$0xff]  ;;  %v3423_v50 = vpop.f32.mrf.mxu0 }
 0x244   : > { %v2473_v13 = vpop.f32.mrf.mxu1  ;;  %v1390_v27 = vadd.f32 %v4780_v58, %v4779_v35  ;;  %v1792_v47 = vadd.f32 %v4781_v38, %v1375_v57  ;;  %v2180_v61 = vadd.f32 %v4543_v20, %v1793_v5  ;;  %v2637_v57 = vld [vmem:[%s4016_s16 + $0xc0] sm:$0xff]  ;;  %v2640_v35 = vld [vmem:[%s4016_s16 + $0xd8] sm:$0xff] }
 0x245   : > { %2694 = vst.msk [vmem:[%s4016_s16 + $0x88] sm:$0xff] %vm225_vm2, %v2662_v62  ;;  %v2661_v48 = vadd.f32 %v2629_v16, %v2597_v59  ;;  %v2600_v29 = vadd.f32 %v4417_v28, %v2561_v12  ;;  %v2560_v45 = vadd.f32 %v2473_v13, %v2173_v26  ;;  %v4782_v59 = vld [vmem:[#allocation27_spill] sm:$0xff]  ;;  %v4783_v12 = vld [vmem:[#allocation32_spill] sm:$0xff] }
 0x246   : > { %v3458_v24 = vpop.f32.mrf.mxu1  ;;  %v1385_v42 = vadd.f32 %v4783_v12, %v4782_v59  ;;  %v1795_v34 = vadd.f32 %v4784_v49, %v1390_v27  ;;  %v2179_v16 = vadd.f32 %v4561_v17, %v1792_v47 }
 0x247   : > { %2693 = vst.msk [vmem:[%s4016_s16 + $0x80] sm:$0xff] %vm225_vm2, %v2661_v48  ;;  %v2664_v53 = vadd.f32 %v2632_v32, %v2600_v29  ;;  %v2599_v8 = vadd.f32 %v4417_v28, %v2560_v45  ;;  %v2563_v25 = vadd.f32 %v3458_v24, %v2176_v21  ;;  %v4785_v48 = vld [vmem:[#allocation29_spill] sm:$0xff]  ;;  %v4786_v29 = vld [vmem:[#allocation34_spill] sm:$0xff] }
 0x248   : > { %v2483_v46 = vpop.f32.mrf.mxu1  ;;  %v1400_v45 = vadd.f32 %v4786_v29, %v4785_v48  ;;  %v1794_v4 = vadd.f32 %v4787_v60, %v1385_v42  ;;  %v2182_v32 = vadd.f32 %v3417_v43, %v1795_v34  ;;  %v2642_v42 = vld [vmem:[%s4016_s16 + $0xe8] sm:$0xff] }
 0x249   : > { %2696 = vst.msk [vmem:[%s4016_s16 + $0x98] sm:$0xff] %vm225_vm2, %v2664_v53  ;;  %v2663_v41 = vadd.f32 %v2631_v39, %v2599_v8  ;;  %v2602_v63 = vadd.f32 %v4417_v28, %v2563_v25  ;;  %v2562_v11 = vadd.f32 %v2483_v46, %v2175_v37  ;;  %v4788_v53 = vld [vmem:[#allocation31_spill] sm:$0xff]  ;;  %v4789_v8 = vld [vmem:[#allocation36_spill] sm:$0xff] }
 0x24a   : > { %v3461_v33 = vpop.f32.mrf.mxu1  ;;  %v1395_v25 = vadd.f32 %v4789_v8, %v4788_v53  ;;  %v1797_v36 = vadd.f32 %v4790_v30, %v1400_v45  ;;  %v2181_v7 = vadd.f32 %v2126_v22, %v1794_v4  ;;  %v2644_v45 = vld [vmem:[%s4016_s16 + $0xf8] sm:$0xff] }
 0x24b   : > { %2695 = vst.msk [vmem:[%s4016_s16 + $0x90] sm:$0xff] %vm225_vm2, %v2663_v41  ;;  %v2666_v0 = vadd.f32 %v2634_v18, %v2602_v63  ;;  %v2601_v3 = vadd.f32 %v4417_v28, %v2562_v11  ;;  %v2565_v6 = vadd.f32 %v3461_v33, %v2178_v10  ;;  %v4791_v10 = vld [vmem:[#allocation33_spill] sm:$0xff]  ;;  %v4793_v11 = vld [vmem:[#allocation58_spill] sm:$0xff] }
 0x24c   : > { %v2493_v56 = vpop.f32.mrf.mxu1  ;;  %v4792_v41 = vld [vmem:[#allocation37_spill] sm:$0xff]  ;;  %v1796_v54 = vadd.f32 %v4793_v11, %v1395_v25  ;;  %v2184_v5 = vadd.f32 %v3420_v40, %v1797_v36 }
 0x24d   : > { %2698 = vst.msk [vmem:[%s4016_s16 + $0xa8] sm:$0xff] %vm225_vm2, %v2666_v0  ;;  %v2665_v23 = vadd.f32 %v2633_v19, %v2601_v3  ;;  %v2604_v26 = vadd.f32 %v4417_v28, %v2565_v6  ;;  %v2564_v62 = vadd.f32 %v2493_v56, %v2177_v44  ;;  %v1410_v63 = vadd.f32 %v4792_v41, %v4791_v10  ;;  %v4794_v44 = vld [vmem:[#allocation35_spill] sm:$0xff]  ;;  %v4795_v0 = vld [vmem:[#allocation38_spill] sm:$0xff] }
 0x24e   : > { %v3464_v1 = vpop.f32.mrf.mxu1  ;;  %v1405_v3 = vadd.f32 %v4795_v0, %v4794_v44  ;;  %v2183_v27 = vadd.f32 %v2136_v31, %v1796_v54  ;;  %v4796_v19 = vld [vmem:[#allocation59_spill] sm:$0xff]  ;;  %v2643_v31 = vld [vmem:[%s4016_s16 + $0xf0] sm:$0xff] }
 0x24f   : > { %2697 = vst.msk [vmem:[%s4016_s16 + $0xa0] sm:$0xff] %vm225_vm2, %v2665_v23  ;;  %v2668_v20 = vadd.f32 %v2636_v9, %v2604_v26  ;;  %v2603_v13 = vadd.f32 %v4417_v28, %v2564_v62  ;;  %v2567_v21 = vadd.f32 %v3464_v1, %v2180_v61  ;;  %v1799_v6 = vadd.f32 %v4404_v14, %v1410_v63  ;;  %v2146_v61 = vpop.f32.mrf.mxu0  ;;  %v2639_v23 = vld [vmem:[%s4016_s16 + $0xd0] sm:$0xff] }
 0x250   : > { %v2503_v2 = vpop.f32.mrf.mxu1  ;;  %v1798_v56 = vadd.f32 %v4796_v19, %v1405_v3 }
 0x251   : > { %2700 = vst.msk [vmem:[%s4016_s16 + $0xb8] sm:$0xff] %vm225_vm2, %v2668_v20  ;;  %v2667_v17 = vadd.f32 %v2635_v52, %v2603_v13  ;;  %v2606_v24 = vadd.f32 %v4417_v28, %v2567_v21  ;;  %v2566_v37 = vadd.f32 %v2503_v2, %v2179_v16  ;;  %v2186_v62 = vadd.f32 %v3423_v50, %v1799_v6  ;;  %v2641_v20 = vld [vmem:[%s4016_s16 + $0xe0] sm:$0xff] }
 0x252   : > { %v3467_v55 = vpop.f32.mrf.mxu1  ;;  %v2185_v34 = vadd.f32 %v2146_v61, %v1798_v56 }
 0x253   : > { %2699 = vst.msk [vmem:[%s4016_s16 + $0xb0] sm:$0xff] %vm225_vm2, %v2667_v17  ;;  %v2670_v43 = vadd.f32 %v2638_v15, %v2606_v24  ;;  %v2605_v39 = vadd.f32 %v4417_v28, %v2566_v37  ;;  %v2569_v46 = vadd.f32 %v3467_v55, %v2182_v32 }
 0x254   : > { %v2513_v51 = vpop.f32.mrf.mxu1 }
 0x255   : > { %2702 = vst.msk [vmem:[%s4016_s16 + $0xc8] sm:$0xff] %vm225_vm2, %v2670_v43  ;;  %v2669_v22 = vadd.f32 %v2637_v57, %v2605_v39  ;;  %v2608_v18 = vadd.f32 %v4417_v28, %v2569_v46  ;;  %v2568_v33 = vadd.f32 %v2513_v51, %v2181_v7 }
 0x256   : > { %v3470_v58 = vpop.f32.mrf.mxu1 }
 0x257   : > { %2701 = vst.msk [vmem:[%s4016_s16 + $0xc0] sm:$0xff] %vm225_vm2, %v2669_v22  ;;  %v2672_v38 = vadd.f32 %v2640_v35, %v2608_v18  ;;  %v2607_v47 = vadd.f32 %v4417_v28, %v2568_v33  ;;  %v2571_v40 = vadd.f32 %v3470_v58, %v2184_v5 }
 0x258   : > { %v2523_v26 = vpop.f32.mrf.mxu1 }
 0x259   : > { %2704 = vst.msk [vmem:[%s4016_s16 + $0xd8] sm:$0xff] %vm225_vm2, %v2672_v38  ;;  %v2671_v14 = vadd.f32 %v2639_v23, %v2607_v47  ;;  %v2610_v59 = vadd.f32 %v4417_v28, %v2571_v40  ;;  %v2570_v12 = vadd.f32 %v2523_v26, %v2183_v27 }
 0x25a   : > { %v3473_v49 = vpop.f32.mrf.mxu1 }
 0x25b   : > { %2703 = vst.msk [vmem:[%s4016_s16 + $0xd0] sm:$0xff] %vm225_vm2, %v2671_v14  ;;  %v2674_v9 = vadd.f32 %v2642_v42, %v2610_v59  ;;  %v2609_v1 = vadd.f32 %v4417_v28, %v2570_v12  ;;  %v2573_v16 = vadd.f32 %v3473_v49, %v2186_v62 }
 0x25c   : > { %v2533_v13 = vpop.f32.mrf.mxu1 }
 0x25d   : > { %2706 = vst.msk [vmem:[%s4016_s16 + $0xe8] sm:$0xff] %vm225_vm2, %v2674_v9  ;;  %v2673_v21 = vadd.f32 %v2641_v20, %v2609_v1  ;;  %v2612_v48 = vadd.f32 %v4417_v28, %v2573_v16  ;;  %v2572_v29 = vadd.f32 %v2533_v13, %v2185_v34 }
 0x25f   : > { %2705 = vst.msk [vmem:[%s4016_s16 + $0xe0] sm:$0xff] %vm225_vm2, %v2673_v21  ;;  %v2676_v60 = vadd.f32 %v2644_v45, %v2612_v48  ;;  %v2611_v4 = vadd.f32 %v4417_v28, %v2572_v29 }
 0x261   : > { %2708 = vst.msk [vmem:[%s4016_s16 + $0xf8] sm:$0xff] %vm225_vm2, %v2676_v60  ;;  %v2675_v52 = vadd.f32 %v2643_v31, %v2611_v4 }
 0x263   : > { %2707 = vst.msk [vmem:[%s4016_s16 + $0xf0] sm:$0xff] %vm225_vm2, %v2675_v52 }
 0x264 PF: > { %s15_s18 = sadd.s32 1, %s3490_s18  }
 0x265   : > { %p12_p4 = scmp.ge.s32.totalorder %s15_s18, 4  }
 0x267   :  { %14 = sbr.rel (!%p12_p4) target bundleno = 1 (0x1), region = 74 }

</bundles_post_ra>
